<compile_context>
chip_gen: v6e
topology: v6e:2x2x1
jax: 0.10.0
libtpu: 0.0.40
codegen_flags: <defaults>
</compile_context>

<pallas_src>
import functools
import math

import jax
import jax.numpy as jnp
from jax.experimental import pallas as pl
from jax.experimental.pallas import tpu as pltpu

# ---------------- small synthetic config (full model: EMBED=768, DEPTH=12) ----------------
BATCH = 2
IN_CH = 3
IMG = 16
PATCH = 4
EMBED = 32
DEPTH = 2
HEADS = 4
MLP_RATIO = 4
NUM_CLASSES = 8
CAMERA_NUM = 2
VIEW_NUM = 2
SIE_COE = 1.0           # cfg.MODEL.SIE_COE
LN_EPS = 1e-6
BN_EPS = 1e-5

N_PATCH = (IMG // PATCH) * (IMG // PATCH)
SEQ = N_PATCH + 1                      # + cls token
SEQ_PAD = ((SEQ + 7) // 8) * 8         # pad to sublane multiple; keys >= SEQ are masked
HEAD_DIM = EMBED // HEADS

# Tile budgets.  tm aligned to 256 (MXU-width, also satisfies bf16 sublane packing),
# tn to 128 lanes, tk to 128.  Footprint at full size (512x1536 bf16 LHS + 1536x256
# bf16 RHS, double-buffered, + f32 acc) is ~6.5 MiB -- fits v7x's 64 MiB VMEM easily.
TM_TARGET = 512
TN_TARGET = 256
TK_TARGET = 1536
VMEM_LIMIT_BYTES = 48 * 1024 * 1024


def _pick_tile(dim, target, align):
    """Largest tile <= target that is align-aligned and divides dim, else full dim."""
    if dim <= target:
        return dim
    t = (target // align) * align
    while t >= align:
        if dim % t == 0:
            return t
        t -= align
    return dim


def _heads_per_group(heads, head_dim):
    """Group heads so each group's lane width targets 128 (unmasked slices/stores)."""
    if head_dim >= 128:
        return 1
    hpg = min(heads, max(1, 128 // head_dim))
    while heads % hpg != 0:
        hpg -= 1
    return hpg


# ---------------------------------------------------------------------------
# Tiled matmul (+bias, +GELU, +residual fused into the epilogue), K-tiled
# ---------------------------------------------------------------------------
def _matmul_kernel(*refs, activation, has_bias, has_res):
    x_ref, w_ref = refs[0], refs[1]
    pos = 2
    b_ref = None
    r_ref = None
    if has_bias:
        b_ref = refs[pos]
        pos += 1
    if has_res:
        r_ref = refs[pos]
        pos += 1
    o_ref = refs[pos]
    acc_ref = refs[pos + 1]

    @pl.when(pl.program_id(2) == 0)
    def _():
        acc_ref[...] = jnp.zeros_like(acc_ref)

    acc_ref[...] += jnp.dot(x_ref[...], w_ref[...],
                            preferred_element_type=jnp.float32)

    @pl.when(pl.program_id(2) == pl.num_programs(2) - 1)
    def _():
        y = acc_ref[...]
        if has_bias:
            y = y + b_ref[...]                      # (1, tn) f32 broadcast
        if activation == "gelu":
            y = jax.nn.gelu(y, approximate=True)
        if has_res:
            y = y + r_ref[...].astype(jnp.float32)  # fused residual add
        o_ref[...] = y.astype(o_ref.dtype)


def matmul(x, w, b=None, residual=None, activation=None, out_dtype=jnp.bfloat16):
    """x:(M,K) @ w:(K,N) [+bias] [+GELU] [+residual] -> (M,N). Weights expected bf16."""
    M, K = x.shape
    K2, N = w.shape
    assert K == K2
    has_bias = b is not None
    has_res = residual is not None

    tm = _pick_tile(M, TM_TARGET, 256)
    tn = _pick_tile(N, TN_TARGET, 128)
    tk = _pick_tile(K, TK_TARGET, 128)
    grid = (M // tm, N // tn, K // tk)

    inputs = [x.astype(jnp.bfloat16), w.astype(jnp.bfloat16)]
    in_specs = [
        pl.BlockSpec((tm, tk), lambda i, j, k: (i, k)),
        pl.BlockSpec((tk, tn), lambda i, j, k: (k, j)),
    ]
    if has_bias:
        inputs.append(b.reshape(1, N).astype(jnp.float32))
        in_specs.append(pl.BlockSpec((1, tn), lambda i, j, k: (0, j)))
    if has_res:
        inputs.append(residual.astype(jnp.bfloat16))
        in_specs.append(pl.BlockSpec((tm, tn), lambda i, j, k: (i, j)))

    out_bytes = jnp.dtype(out_dtype).itemsize
    bytes_accessed = (M * K + K * N) * 2 + M * N * out_bytes
    if has_bias:
        bytes_accessed += N * 4
    if has_res:
        bytes_accessed += M * N * 2
    cost = pl.CostEstimate(flops=2 * M * K * N, transcendentals=0,
                           bytes_accessed=bytes_accessed)

    return pl.pallas_call(
        functools.partial(_matmul_kernel, activation=activation,
                          has_bias=has_bias, has_res=has_res),
        out_shape=jax.ShapeDtypeStruct((M, N), out_dtype),
        grid=grid,
        in_specs=in_specs,
        out_specs=pl.BlockSpec((tm, tn), lambda i, j, k: (i, j)),
        scratch_shapes=[pltpu.VMEM((tm, tn), jnp.float32)],
        compiler_params=pltpu.CompilerParams(
            dimension_semantics=("parallel", "parallel", "arbitrary"),
            vmem_limit_bytes=VMEM_LIMIT_BYTES),
        cost_estimate=cost,
    )(*inputs)


# ---------------------------------------------------------------------------
# LayerNorm fused into the matmul prologue (single K step: full row resident)
# ---------------------------------------------------------------------------
def _ln_matmul_kernel(*refs, activation, has_res):
    x_ref, g_ref, bt_ref, w_ref, b_ref = refs[:5]
    pos = 5
    r_ref = None
    if has_res:
        r_ref = refs[pos]
        pos += 1
    o_ref = refs[pos]

    x = x_ref[...].astype(jnp.float32)                       # (tm, K) full row
    mu = jnp.mean(x, axis=-1, keepdims=True)
    var = jnp.mean(jnp.square(x - mu), axis=-1, keepdims=True)
    xn = ((x - mu) * jax.lax.rsqrt(var + LN_EPS) * g_ref[...] + bt_ref[...])
    y = jnp.dot(xn.astype(jnp.bfloat16), w_ref[...],
                preferred_element_type=jnp.float32)
    y = y + b_ref[...]                                       # (1, tn) f32 broadcast
    if activation == "gelu":
        y = jax.nn.gelu(y, approximate=True)
    if has_res:
        y = y + r_ref[...].astype(jnp.float32)
    o_ref[...] = y.astype(o_ref.dtype)


def ln_matmul(x, gamma, beta, w, b, residual=None, activation=None,
              out_dtype=jnp.bfloat16):
    """LayerNorm(x) @ w + b [+GELU] [+residual]; requires K to fit one block."""
    M, K = x.shape
    K2, N = w.shape
    assert K == K2
    assert K <= TK_TARGET, "ln_matmul requires a single K step"
    has_res = residual is not None

    tm = _pick_tile(M, TM_TARGET, 256)
    tn = _pick_tile(N, TN_TARGET, 128)
    grid = (M // tm, N // tn)

    inputs = [x.astype(jnp.bfloat16),
              gamma.reshape(1, K).astype(jnp.float32),
              beta.reshape(1, K).astype(jnp.float32),
              w.astype(jnp.bfloat16),
              b.reshape(1, N).astype(jnp.float32)]
    in_specs = [
        pl.BlockSpec((tm, K), lambda i, j: (i, 0)),
        pl.BlockSpec((1, K), lambda i, j: (0, 0)),
        pl.BlockSpec((1, K), lambda i, j: (0, 0)),
        pl.BlockSpec((K, tn), lambda i, j: (0, j)),
        pl.BlockSpec((1, tn), lambda i, j: (0, j)),
    ]
    if has_res:
        inputs.append(residual.astype(jnp.bfloat16))
        in_specs.append(pl.BlockSpec((tm, tn), lambda i, j: (i, j)))

    out_bytes = jnp.dtype(out_dtype).itemsize
    bytes_accessed = M * K * 2 + K * N * 2 + M * N * out_bytes + 2 * K * 4 + N * 4
    if has_res:
        bytes_accessed += M * N * 2
    cost = pl.CostEstimate(flops=2 * M * K * N + 8 * M * K, transcendentals=M,
                           bytes_accessed=bytes_accessed)

    return pl.pallas_call(
        functools.partial(_ln_matmul_kernel, activation=activation, has_res=has_res),
        out_shape=jax.ShapeDtypeStruct((M, N), out_dtype),
        grid=grid,
        in_specs=in_specs,
        out_specs=pl.BlockSpec((tm, tn), lambda i, j: (i, j)),
        compiler_params=pltpu.CompilerParams(
            dimension_semantics=("parallel", "parallel"),
            vmem_limit_bytes=VMEM_LIMIT_BYTES),
        cost_estimate=cost,
    )(*inputs)


# ---------------------------------------------------------------------------
# Multi-head attention: heads packed on the lane axis, processed in 128-lane
# groups; K transposed once per grid step; additive key mask; scale folded in q.
# ---------------------------------------------------------------------------
def _attention_kernel(qkv_ref, o_ref, *, heads, head_dim, seq_valid, scale,
                      heads_per_group):
    s_pad = qkv_ref.shape[1]
    d = heads * head_dim
    qkv = qkv_ref[0]                                         # (S_pad, 3D) bf16

    # scale q once (cheap, amortized over all heads)
    q_all = (qkv[:, :d].astype(jnp.float32) * scale).astype(jnp.bfloat16)
    # one XLU transpose of the whole K slab instead of an NT contraction per head
    k_t = qkv[:, d:2 * d].T                                  # (D, S_pad) bf16
    v_all = qkv[:, 2 * d:]                                   # (S_pad, D) bf16

    # additive key-padding bias, computed once: (1, S_pad)
    key_pos = jax.lax.broadcasted_iota(jnp.int32, (1, s_pad), 1)
    mask_bias = jnp.where(key_pos < seq_valid, 0.0, -1e30).astype(jnp.float32)

    gw = heads_per_group * head_dim
    for g in range(heads // heads_per_group):
        outs = []
        for hh in range(heads_per_group):
            h = g * heads_per_group + hh
            qh = q_all[:, h * head_dim:(h + 1) * head_dim]
            kth = k_t[h * head_dim:(h + 1) * head_dim, :]    # sublane slice (mult of 8)
            vh = v_all[:, h * head_dim:(h + 1) * head_dim]
            s = jnp.dot(qh, kth, preferred_element_type=jnp.float32) + mask_bias
            m = jnp.max(s, axis=-1, keepdims=True)
            p = jnp.exp(s - m)
            denom = jnp.sum(p, axis=-1, keepdims=True)
            p = p * pl.reciprocal(denom, approx=True)        # EUP, off the VALU slot
            outs.append(jnp.dot(p.astype(jnp.bfloat16), vh,
                                preferred_element_type=jnp.float32))
        blk = outs[0] if heads_per_group == 1 else jnp.concatenate(outs, axis=-1)
        # direct lane-aligned store of this head group (128-wide at full model size)
        o_ref[0, :, g * gw:(g + 1) * gw] = blk.astype(o_ref.dtype)


def attention(qkv, seq_valid):
    """qkv: (B, S_pad, 3*D) with heads contiguous on the lane axis -> (B, S_pad, D)."""
    B, S_pad, three_d = qkv.shape
    D = three_d // 3
    hpg = _heads_per_group(HEADS, HEAD_DIM)
    cost = pl.CostEstimate(
        flops=4 * B * HEADS * S_pad * S_pad * HEAD_DIM,
        transcendentals=B * HEADS * S_pad * S_pad,
        bytes_accessed=B * S_pad * three_d * 2 + B * S_pad * D * 2)
    return pl.pallas_call(
        functools.partial(_attention_kernel, heads=HEADS, head_dim=HEAD_DIM,
                          seq_valid=seq_valid, scale=HEAD_DIM ** -0.5,
                          heads_per_group=hpg),
        out_shape=jax.ShapeDtypeStruct((B, S_pad, D), jnp.bfloat16),
        grid=(B,),
        in_specs=[pl.BlockSpec((1, S_pad, three_d), lambda b: (b, 0, 0))],
        out_specs=pl.BlockSpec((1, S_pad, D), lambda b: (b, 0, 0)),
        compiler_params=pltpu.CompilerParams(
            dimension_semantics=("parallel",),
            vmem_limit_bytes=VMEM_LIMIT_BYTES),
        cost_estimate=cost,
    )(qkv.astype(jnp.bfloat16))


# ---------------------------------------------------------------------------
# Fused head: LayerNorm on the cls token + BatchNorm1d bottleneck (tiny, one launch)
# ---------------------------------------------------------------------------
def _cls_head_kernel(x_ref, lng_ref, lnb_ref, bng_ref, bnb_ref, gf_ref, feat_ref):
    x = x_ref[...].astype(jnp.float32)                        # (B, D)
    mu = jnp.mean(x, axis=-1, keepdims=True)
    var = jnp.mean(jnp.square(x - mu), axis=-1, keepdims=True)
    gf = (x - mu) * jax.lax.rsqrt(var + LN_EPS) * lng_ref[...] + lnb_ref[...]
    gf_ref[...] = gf                                          # global_feat (pre-BN)
    bmu = jnp.mean(gf, axis=0, keepdims=True)                 # batch statistics
    bvar = jnp.mean(jnp.square(gf - bmu), axis=0, keepdims=True)
    feat_ref[...] = (gf - bmu) * jax.lax.rsqrt(bvar + BN_EPS) * bng_ref[...] + bnb_ref[...]


def cls_head(cls_tok, ln_g, ln_b, bn_g, bn_b):
    B, D = cls_tok.shape
    vec = pl.BlockSpec((1, D), lambda i: (0, 0))
    full = pl.BlockSpec((B, D), lambda i: (0, 0))
    return pl.pallas_call(
        _cls_head_kernel,
        out_shape=(jax.ShapeDtypeStruct((B, D), jnp.float32),
                   jax.ShapeDtypeStruct((B, D), jnp.float32)),
        grid=(1,),
        in_specs=[full, vec, vec, vec, vec],
        out_specs=(full, full),
    )(cls_tok.astype(jnp.float32),
      ln_g.reshape(1, D).astype(jnp.float32),
      ln_b.reshape(1, D).astype(jnp.float32),
      bn_g.reshape(1, D).astype(jnp.float32),
      bn_b.reshape(1, D).astype(jnp.float32))


# ---------------------------------------------------------------------------
# Model (glue around the kernels)
# ---------------------------------------------------------------------------
def patch_embed(x, w, b):
    """Conv2d(C, D, k=P, stride=P) on NCHW input, as im2col + Pallas matmul."""
    B, C, H, W = x.shape
    nH, nW = H // PATCH, W // PATCH
    patches = x.reshape(B, C, nH, PATCH, nW, PATCH)
    patches = patches.transpose(0, 2, 4, 1, 3, 5)            # (B, nH, nW, C, P, P)
    patches = patches.reshape(B * nH * nW, C * PATCH * PATCH)
    out = matmul(patches, w, b)                              # (B*nP, D) bf16
    return out.reshape(B, nH * nW, EMBED)


def vit_block(x_tok, p):
    B, S, D = x_tok.shape
    x = x_tok.reshape(B * S, D)                              # bf16 residual stream

    # --- attention: LN fused into the qkv matmul prologue ---
    qkv = ln_matmul(x, p["ln1_g"], p["ln1_b"], p["qkv_w"], p["qkv_b"])   # (B*S, 3D)
    o = attention(qkv.reshape(B, S, 3 * D), seq_valid=SEQ)               # (B, S, D)
    x = matmul(o.reshape(B * S, D), p["proj_w"], p["proj_b"], residual=x)

    # --- MLP: LN fused into fc1 prologue, residual fused into fc2 epilogue ---
    h = ln_matmul(x, p["ln2_g"], p["ln2_b"], p["fc1_w"], p["fc1_b"], activation="gelu")
    x = matmul(h, p["fc2_w"], p["fc2_b"], residual=x)
    return x.reshape(B, S, D)


def build_transformer_forward(params, x, cam_label, view_label):
    """Training-mode forward: returns (cls_score, global_feat)."""
    B = x.shape[0]

    # backbone (self.base): patch embed + cls token + pos/SIE embed + blocks + norm
    tok = patch_embed(x, params["pe_w"], params["pe_b"]).astype(jnp.float32)
    cls = jnp.broadcast_to(params["cls_token"], (B, 1, EMBED))
    tok = jnp.concatenate([cls, tok], axis=1)                # (B, SEQ, D) f32
    sie_idx = cam_label * VIEW_NUM + view_label              # (B,)
    tok = tok + params["pos_embed"] + SIE_COE * params["sie_embed"][sie_idx]
    tok = tok.astype(jnp.bfloat16)
    # pad the sequence to a sublane multiple; padded keys are masked in attention
    tok = jnp.pad(tok, ((0, 0), (0, SEQ_PAD - SEQ), (0, 0)))

    for blk in params["blocks"]:
        tok = vit_block(tok, blk)

    # final LayerNorm only on the cls token, fused with the BN bottleneck
    cls_tok = tok[:, 0]                                      # (B, D) bf16
    global_feat, feat = cls_head(cls_tok, params["norm_g"], params["norm_b"],
                                 params["bn_g"], params["bn_b"])

    # classifier: Linear(in_planes, num_classes, bias=False) -- tiny, left to XLA
    cls_score = jnp.dot(feat, params["cls_w"], preferred_element_type=jnp.float32)
    return cls_score, global_feat


# ---------------------------------------------------------------------------
# Deterministic parameter init (shapes from the module __init__; synthetic values)
# Matmul weights are stored in bf16 up front (no per-forward conversion traffic).
# ---------------------------------------------------------------------------
def init_params(key):
    keys = iter(jax.random.split(key, 16 + DEPTH * 8))

    def nrm(shape, std, dtype=jnp.float32):
        return (std * jax.random.normal(next(keys), shape, jnp.float32)).astype(dtype)

    params = {}
    fan_in = IN_CH * PATCH * PATCH
    params["pe_w"] = nrm((fan_in, EMBED), math.sqrt(2.0 / fan_in), jnp.bfloat16)
    params["pe_b"] = jnp.zeros((EMBED,), jnp.float32)
    params["cls_token"] = nrm((1, 1, EMBED), 0.02)
    params["pos_embed"] = nrm((1, SEQ, EMBED), 0.02)
    params["sie_embed"] = nrm((CAMERA_NUM * VIEW_NUM, 1, EMBED), 0.02)

    blocks = []
    for _ in range(DEPTH):
        blocks.append({
            "ln1_g": jnp.ones((EMBED,), jnp.float32),
            "ln1_b": jnp.zeros((EMBED,), jnp.float32),
            "qkv_w": nrm((EMBED, 3 * EMBED), 0.02, jnp.bfloat16),
            "qkv_b": jnp.zeros((3 * EMBED,), jnp.float32),
            "proj_w": nrm((EMBED, EMBED), 0.02, jnp.bfloat16),
            "proj_b": jnp.zeros((EMBED,), jnp.float32),
            "ln2_g": jnp.ones((EMBED,), jnp.float32),
            "ln2_b": jnp.zeros((EMBED,), jnp.float32),
            "fc1_w": nrm((EMBED, MLP_RATIO * EMBED), 0.02, jnp.bfloat16),
            "fc1_b": jnp.zeros((MLP_RATIO * EMBED,), jnp.float32),
            "fc2_w": nrm((MLP_RATIO * EMBED, EMBED), 0.02, jnp.bfloat16),
            "fc2_b": jnp.zeros((EMBED,), jnp.float32),
        })
    params["blocks"] = blocks

    params["norm_g"] = jnp.ones((EMBED,), jnp.float32)
    params["norm_b"] = jnp.zeros((EMBED,), jnp.float32)
    # bottleneck BN: weights_init_kaiming -> weight=1, bias=0 (bias frozen)
    params["bn_g"] = jnp.ones((EMBED,), jnp.float32)
    params["bn_b"] = jnp.zeros((EMBED,), jnp.float32)
    # classifier: weights_init_classifier -> normal(std=0.001), no bias
    params["cls_w"] = nrm((EMBED, NUM_CLASSES), 0.001)
    return params


if __name__ == "__main__":
    key = jax.random.PRNGKey(0)
    k_param, k_x, k_cam, k_view = jax.random.split(key, 4)

    params = init_params(k_param)
    x = jax.random.normal(k_x, (BATCH, IN_CH, IMG, IMG), jnp.float32)   # NCHW
    cam_label = jax.random.randint(k_cam, (BATCH,), 0, CAMERA_NUM)
    view_label = jax.random.randint(k_view, (BATCH,), 0, VIEW_NUM)

    cls_score, global_feat = jax.jit(build_transformer_forward)(
        params, x, cam_label, view_label)
    jax.block_until_ready((cls_score, global_feat))

    assert cls_score.shape == (BATCH, NUM_CLASSES)
    assert global_feat.shape == (BATCH, EMBED)
    assert bool(jnp.all(jnp.isfinite(cls_score))) and bool(jnp.all(jnp.isfinite(global_feat)))
    print("KERNEL_OK")
</pallas_src>

<mosaic_0001>
module attributes {stable_mosaic.version = 11 : i64} {
  func.func @_matmul_kernel(%arg0: i32, %arg1: i32, %arg2: i32, %arg3: memref<32x48xbf16, #tpu.memory_space<vmem>>, %arg4: memref<48x32xbf16, #tpu.memory_space<vmem>>, %arg5: memref<1x32xf32, #tpu.memory_space<vmem>>, %arg6: memref<32x32xbf16, #tpu.memory_space<vmem>>, %arg7: memref<32x32xf32, #tpu.memory_space<vmem>>) attributes {dimension_semantics = [#tpu.dimension_semantics<parallel>, #tpu.dimension_semantics<parallel>, #tpu.dimension_semantics<arbitrary>], iteration_bounds = array<i64: 1, 1, 1>, scalar_prefetch = 0 : i64, scratch_operands = 1 : i64, tpu.core_type = #tpu.core_type<tc>, window_params = [{transform_indices = @transform_0, window_bounds = array<i64: 32, 48>}, {transform_indices = @transform_1, window_bounds = array<i64: 48, 32>}, {transform_indices = @transform_2, window_bounds = array<i64: 1, 32>}, {transform_indices = @transform_3, window_bounds = array<i64: 32, 32>}]} {
    %c0_i32 = arith.constant 0 : i32
    %0 = arith.cmpi eq, %arg2, %c0_i32 : i32
    %1 = arith.extui %0 : i1 to i32
    %c0_i32_0 = arith.constant 0 : i32
    %2 = arith.cmpi ne, %1, %c0_i32_0 : i32
    scf.if %2 {
      %cst_10 = arith.constant 0.000000e+00 : f32
      %12 = vector.broadcast %cst_10 : f32 to vector<32x32xf32>
      %c0_11 = arith.constant 0 : index
      %c0_12 = arith.constant 0 : index
      %13 = vector.load %arg7[%c0_11, %c0_12] : memref<32x32xf32, #tpu.memory_space<vmem>>, vector<32x32xf32>
      tpu.vector_store %arg7[%c0_11, %c0_12], %12 {strides = array<i32>} : memref<32x32xf32, #tpu.memory_space<vmem>>, vector<32x32xf32>,
    } else {
    }
    %c0 = arith.constant 0 : index
    %c0_1 = arith.constant 0 : index
    %3 = vector.load %arg7[%c0, %c0_1] : memref<32x32xf32, #tpu.memory_space<vmem>>, vector<32x32xf32>
    %c0_2 = arith.constant 0 : index
    %c0_3 = arith.constant 0 : index
    %4 = vector.load %arg3[%c0_2, %c0_3] : memref<32x48xbf16, #tpu.memory_space<vmem>>, vector<32x48xbf16>
    %c0_4 = arith.constant 0 : index
    %c0_5 = arith.constant 0 : index
    %5 = vector.load %arg4[%c0_4, %c0_5] : memref<48x32xbf16, #tpu.memory_space<vmem>>, vector<48x32xbf16>
    %cst = arith.constant dense<0.000000e+00> : vector<32x32xf32>
    %6 = tpu.matmul %4, %5, %cst {dimension_numbers = #tpu.dot_dimension_numbers<[1], [0], [0], [1], [0, 0, 1, 1], [], []>} : vector<32x48xbf16>, vector<48x32xbf16>, vector<32x32xf32> -> vector<32x32xf32>
    %7 = arith.addf %3, %6 : vector<32x32xf32>
    %c0_6 = arith.constant 0 : index
    %c0_7 = arith.constant 0 : index
    %8 = vector.load %arg7[%c0_6, %c0_7] : memref<32x32xf32, #tpu.memory_space<vmem>>, vector<32x32xf32>
    tpu.vector_store %arg7[%c0_6, %c0_7], %7 {strides = array<i32>} : memref<32x32xf32, #tpu.memory_space<vmem>>, vector<32x32xf32>,
    %c0_i32_8 = arith.constant 0 : i32
    %9 = arith.cmpi eq, %arg2, %c0_i32_8 : i32
    %10 = arith.extui %9 : i1 to i32
    %c0_i32_9 = arith.constant 0 : i32
    %11 = arith.cmpi ne, %10, %c0_i32_9 : i32
    scf.if %11 {
      %c0_10 = arith.constant 0 : index
      %c0_11 = arith.constant 0 : index
      %12 = vector.load %arg7[%c0_10, %c0_11] : memref<32x32xf32, #tpu.memory_space<vmem>>, vector<32x32xf32>
      %c0_12 = arith.constant 0 : index
      %c0_13 = arith.constant 0 : index
      %13 = vector.load %arg5[%c0_12, %c0_13] : memref<1x32xf32, #tpu.memory_space<vmem>>, vector<1x32xf32>
      %14 = vector.broadcast %13 : vector<1x32xf32> to vector<32x32xf32>
      %15 = arith.addf %12, %14 : vector<32x32xf32>
      %16 = arith.truncf %15 : vector<32x32xf32> to vector<32x32xbf16>
      %c0_14 = arith.constant 0 : index
      %c0_15 = arith.constant 0 : index
      %17 = vector.load %arg6[%c0_14, %c0_15] : memref<32x32xbf16, #tpu.memory_space<vmem>>, vector<32x32xbf16>
      tpu.vector_store %arg6[%c0_14, %c0_15], %16 {strides = array<i32>} : memref<32x32xbf16, #tpu.memory_space<vmem>>, vector<32x32xbf16>,
    } else {
    }
    return
  }
  func.func @transform_0(%arg0: i32, %arg1: i32, %arg2: i32) -> (i32, i32) {
    %c0_i32 = arith.constant 0 : i32
    return %arg0, %arg2 : i32, i32
  }
  func.func @transform_1(%arg0: i32, %arg1: i32, %arg2: i32) -> (i32, i32) {
    %c0_i32 = arith.constant 0 : i32
    return %arg2, %arg1 : i32, i32
  }
  func.func @transform_2(%arg0: i32, %arg1: i32, %arg2: i32) -> (i32, i32) {
    %c0_i32 = arith.constant 0 : i32
    %c0_i32_0 = arith.constant 0 : i32
    return %c0_i32, %arg1 : i32, i32
  }
  func.func @transform_3(%arg0: i32, %arg1: i32, %arg2: i32) -> (i32, i32) {
    %c0_i32 = arith.constant 0 : i32
    return %arg0, %arg1 : i32, i32
  }
}

module attributes {stable_mosaic.version = 11 : i64} {
  func.func @_attention_kernel(%arg0: i32, %arg1: memref<1x24x96xbf16, #tpu.memory_space<vmem>>, %arg2: memref<1x24x32xbf16, #tpu.memory_space<vmem>>) attributes {dimension_semantics = [#tpu.dimension_semantics<parallel>], iteration_bounds = array<i64: 2>, scalar_prefetch = 0 : i64, scratch_operands = 0 : i64, tpu.core_type = #tpu.core_type<tc>, window_params = [{transform_indices = @transform_0, window_bounds = array<i64: 1, 24, 96>}, {transform_indices = @transform_1, window_bounds = array<i64: 1, 24, 32>}]} {
    %c0 = arith.constant 0 : index
    %c0_0 = arith.constant 0 : index
    %c0_1 = arith.constant 0 : index
    %0 = vector.load %arg1[%c0, %c0_0, %c0_1] : memref<1x24x96xbf16, #tpu.memory_space<vmem>>, vector<1x24x96xbf16>
    %1 = vector.shape_cast %0 : vector<1x24x96xbf16> to vector<24x96xbf16>
    %2 = vector.extract_strided_slice %1 {offsets = [0, 0], sizes = [24, 32], strides = [1, 1]} : vector<24x96xbf16> to vector<24x32xbf16>
    %3 = arith.extf %2 : vector<24x32xbf16> to vector<24x32xf32>
    %cst = arith.constant 0.353553385 : f32
    %4 = vector.broadcast %cst : f32 to vector<24x32xf32>
    %5 = arith.mulf %3, %4 : vector<24x32xf32>
    %6 = arith.truncf %5 : vector<24x32xf32> to vector<24x32xbf16>
    %7 = vector.extract_strided_slice %1 {offsets = [0, 32], sizes = [24, 32], strides = [1, 1]} : vector<24x96xbf16> to vector<24x32xbf16>
    %8 = tpu.transpose %7, [1, 0] : vector<24x32xbf16> -> vector<32x24xbf16>
    %9 = vector.extract_strided_slice %1 {offsets = [0, 64], sizes = [24, 32], strides = [1, 1]} : vector<24x96xbf16> to vector<24x32xbf16>
    %10 = tpu.iota {dimensions = array<i32: 1>} : vector<1x24xi32>
    %c17_i32 = arith.constant 17 : i32
    %11 = vector.broadcast %c17_i32 : i32 to vector<1x24xi32>
    %12 = arith.cmpi slt, %10, %11 : vector<1x24xi32>
    %cst_2 = arith.constant 0.000000e+00 : f32
    %cst_3 = arith.constant -1.000000e+30 : f32
    %13 = vector.broadcast %cst_2 : f32 to vector<1x24xf32>
    %14 = vector.broadcast %cst_3 : f32 to vector<1x24xf32>
    %15 = arith.select %12, %13, %14 : vector<1x24xi1>, vector<1x24xf32>
    %16 = vector.extract_strided_slice %6 {offsets = [0, 0], sizes = [24, 8], strides = [1, 1]} : vector<24x32xbf16> to vector<24x8xbf16>
    %17 = vector.extract_strided_slice %8 {offsets = [0, 0], sizes = [8, 24], strides = [1, 1]} : vector<32x24xbf16> to vector<8x24xbf16>
    %18 = vector.extract_strided_slice %9 {offsets = [0, 0], sizes = [24, 8], strides = [1, 1]} : vector<24x32xbf16> to vector<24x8xbf16>
    %cst_4 = arith.constant dense<0.000000e+00> : vector<24x24xf32>
    %19 = tpu.matmul %16, %17, %cst_4 {dimension_numbers = #tpu.dot_dimension_numbers<[1], [0], [0], [1], [0, 0, 1, 1], [], []>} : vector<24x8xbf16>, vector<8x24xbf16>, vector<24x24xf32> -> vector<24x24xf32>
    %20 = vector.broadcast %15 : vector<1x24xf32> to vector<24x24xf32>
    %21 = arith.addf %19, %20 : vector<24x24xf32>
    %cst_5 = arith.constant dense<0xFF800000> : vector<24xf32>
    %22 = vector.multi_reduction <maximumf>, %21, %cst_5 [1] : vector<24x24xf32> to vector<24xf32>
    %23 = vector.shape_cast %22 : vector<24xf32> to vector<24x1xf32>
    %24 = vector.broadcast %23 : vector<24x1xf32> to vector<24x24xf32>
    %25 = arith.subf %21, %24 : vector<24x24xf32>
    %26 = math.exp %25 : vector<24x24xf32>
    %cst_6 = arith.constant dense<0.000000e+00> : vector<24xf32>
    %27 = vector.multi_reduction <add>, %26, %cst_6 [1] : vector<24x24xf32> to vector<24xf32>
    %28 = vector.shape_cast %27 : vector<24xf32> to vector<24x1xf32>
    %29 = tpu.reciprocal %28 {approx = true} : vector<24x1xf32> -> vector<24x1xf32>
    %30 = vector.broadcast %29 : vector<24x1xf32> to vector<24x24xf32>
    %31 = arith.mulf %26, %30 : vector<24x24xf32>
    %32 = arith.truncf %31 : vector<24x24xf32> to vector<24x24xbf16>
    %cst_7 = arith.constant dense<0.000000e+00> : vector<24x8xf32>
    %33 = tpu.matmul %32, %18, %cst_7 {dimension_numbers = #tpu.dot_dimension_numbers<[1], [0], [0], [1], [0, 0, 1, 1], [], []>} : vector<24x24xbf16>, vector<24x8xbf16>, vector<24x8xf32> -> vector<24x8xf32>
    %34 = vector.extract_strided_slice %6 {offsets = [0, 8], sizes = [24, 8], strides = [1, 1]} : vector<24x32xbf16> to vector<24x8xbf16>
    %35 = vector.extract_strided_slice %8 {offsets = [8, 0], sizes = [8, 24], strides = [1, 1]} : vector<32x24xbf16> to vector<8x24xbf16>
    %36 = vector.extract_strided_slice %9 {offsets = [0, 8], sizes = [24, 8], strides = [1, 1]} : vector<24x32xbf16> to vector<24x8xbf16>
    %cst_8 = arith.constant dense<0.000000e+00> : vector<24x24xf32>
    %37 = tpu.matmul %34, %35, %cst_8 {dimension_numbers = #tpu.dot_dimension_numbers<[1], [0], [0], [1], [0, 0, 1, 1], [], []>} : vector<24x8xbf16>, vector<8x24xbf16>, vector<24x24xf32> -> vector<24x24xf32>
    %38 = vector.broadcast %15 : vector<1x24xf32> to vector<24x24xf32>
    %39 = arith.addf %37, %38 : vector<24x24xf32>
    %cst_9 = arith.constant dense<0xFF800000> : vector<24xf32>
    %40 = vector.multi_reduction <maximumf>, %39, %cst_9 [1] : vector<24x24xf32> to vector<24xf32>
    %41 = vector.shape_cast %40 : vector<24xf32> to vector<24x1xf32>
    %42 = vector.broadcast %41 : vector<24x1xf32> to vector<24x24xf32>
    %43 = arith.subf %39, %42 : vector<24x24xf32>
    %44 = math.exp %43 : vector<24x24xf32>
    %cst_10 = arith.constant dense<0.000000e+00> : vector<24xf32>
    %45 = vector.multi_reduction <add>, %44, %cst_10 [1] : vector<24x24xf32> to vector<24xf32>
    %46 = vector.shape_cast %45 : vector<24xf32> to vector<24x1xf32>
    %47 = tpu.reciprocal %46 {approx = true} : vector<24x1xf32> -> vector<24x1xf32>
    %48 = vector.broadcast %47 : vector<24x1xf32> to vector<24x24xf32>
    %49 = arith.mulf %44, %48 : vector<24x24xf32>
    %50 = arith.truncf %49 : vector<24x24xf32> to vector<24x24xbf16>
    %cst_11 = arith.constant dense<0.000000e+00> : vector<24x8xf32>
    %51 = tpu.matmul %50, %36, %cst_11 {dimension_numbers = #tpu.dot_dimension_numbers<[1], [0], [0], [1], [0, 0, 1, 1], [], []>} : vector<24x24xbf16>, vector<24x8xbf16>, vector<24x8xf32> -> vector<24x8xf32>
    %52 = vector.extract_strided_slice %6 {offsets = [0, 16], sizes = [24, 8], strides = [1, 1]} : vector<24x32xbf16> to vector<24x8xbf16>
    %53 = vector.extract_strided_slice %8 {offsets = [16, 0], sizes = [8, 24], strides = [1, 1]} : vector<32x24xbf16> to vector<8x24xbf16>
    %54 = vector.extract_strided_slice %9 {offsets = [0, 16], sizes = [24, 8], strides = [1, 1]} : vector<24x32xbf16> to vector<24x8xbf16>
    %cst_12 = arith.constant dense<0.000000e+00> : vector<24x24xf32>
    %55 = tpu.matmul %52, %53, %cst_12 {dimension_numbers = #tpu.dot_dimension_numbers<[1], [0], [0], [1], [0, 0, 1, 1], [], []>} : vector<24x8xbf16>, vector<8x24xbf16>, vector<24x24xf32> -> vector<24x24xf32>
    %56 = vector.broadcast %15 : vector<1x24xf32> to vector<24x24xf32>
    %57 = arith.addf %55, %56 : vector<24x24xf32>
    %cst_13 = arith.constant dense<0xFF800000> : vector<24xf32>
    %58 = vector.multi_reduction <maximumf>, %57, %cst_13 [1] : vector<24x24xf32> to vector<24xf32>
    %59 = vector.shape_cast %58 : vector<24xf32> to vector<24x1xf32>
    %60 = vector.broadcast %59 : vector<24x1xf32> to vector<24x24xf32>
    %61 = arith.subf %57, %60 : vector<24x24xf32>
    %62 = math.exp %61 : vector<24x24xf32>
    %cst_14 = arith.constant dense<0.000000e+00> : vector<24xf32>
    %63 = vector.multi_reduction <add>, %62, %cst_14 [1] : vector<24x24xf32> to vector<24xf32>
    %64 = vector.shape_cast %63 : vector<24xf32> to vector<24x1xf32>
    %65 = tpu.reciprocal %64 {approx = true} : vector<24x1xf32> -> vector<24x1xf32>
    %66 = vector.broadcast %65 : vector<24x1xf32> to vector<24x24xf32>
    %67 = arith.mulf %62, %66 : vector<24x24xf32>
    %68 = arith.truncf %67 : vector<24x24xf32> to vector<24x24xbf16>
    %cst_15 = arith.constant dense<0.000000e+00> : vector<24x8xf32>
    %69 = tpu.matmul %68, %54, %cst_15 {dimension_numbers = #tpu.dot_dimension_numbers<[1], [0], [0], [1], [0, 0, 1, 1], [], []>} : vector<24x24xbf16>, vector<24x8xbf16>, vector<24x8xf32> -> vector<24x8xf32>
    %70 = vector.extract_strided_slice %6 {offsets = [0, 24], sizes = [24, 8], strides = [1, 1]} : vector<24x32xbf16> to vector<24x8xbf16>
    %71 = vector.extract_strided_slice %8 {offsets = [24, 0], sizes = [8, 24], strides = [1, 1]} : vector<32x24xbf16> to vector<8x24xbf16>
    %72 = vector.extract_strided_slice %9 {offsets = [0, 24], sizes = [24, 8], strides = [1, 1]} : vector<24x32xbf16> to vector<24x8xbf16>
    %cst_16 = arith.constant dense<0.000000e+00> : vector<24x24xf32>
    %73 = tpu.matmul %70, %71, %cst_16 {dimension_numbers = #tpu.dot_dimension_numbers<[1], [0], [0], [1], [0, 0, 1, 1], [], []>} : vector<24x8xbf16>, vector<8x24xbf16>, vector<24x24xf32> -> vector<24x24xf32>
    %74 = vector.broadcast %15 : vector<1x24xf32> to vector<24x24xf32>
    %75 = arith.addf %73, %74 : vector<24x24xf32>
    %cst_17 = arith.constant dense<0xFF800000> : vector<24xf32>
    %76 = vector.multi_reduction <maximumf>, %75, %cst_17 [1] : vector<24x24xf32> to vector<24xf32>
    %77 = vector.shape_cast %76 : vector<24xf32> to vector<24x1xf32>
    %78 = vector.broadcast %77 : vector<24x1xf32> to vector<24x24xf32>
    %79 = arith.subf %75, %78 : vector<24x24xf32>
    %80 = math.exp %79 : vector<24x24xf32>
    %cst_18 = arith.constant dense<0.000000e+00> : vector<24xf32>
    %81 = vector.multi_reduction <add>, %80, %cst_18 [1] : vector<24x24xf32> to vector<24xf32>
    %82 = vector.shape_cast %81 : vector<24xf32> to vector<24x1xf32>
    %83 = tpu.reciprocal %82 {approx = true} : vector<24x1xf32> -> vector<24x1xf32>
    %84 = vector.broadcast %83 : vector<24x1xf32> to vector<24x24xf32>
    %85 = arith.mulf %80, %84 : vector<24x24xf32>
    %86 = arith.truncf %85 : vector<24x24xf32> to vector<24x24xbf16>
    %cst_19 = arith.constant dense<0.000000e+00> : vector<24x8xf32>
    %87 = tpu.matmul %86, %72, %cst_19 {dimension_numbers = #tpu.dot_dimension_numbers<[1], [0], [0], [1], [0, 0, 1, 1], [], []>} : vector<24x24xbf16>, vector<24x8xbf16>, vector<24x8xf32> -> vector<24x8xf32>
    %88 = tpu.concatenate %33, %51, %69, %87 in 1 : vector<24x8xf32>, vector<24x8xf32>, vector<24x8xf32>, vector<24x8xf32> -> vector<24x32xf32>
    %89 = arith.truncf %88 : vector<24x32xf32> to vector<24x32xbf16>
    %c0_20 = arith.constant 0 : index
    %c0_21 = arith.constant 0 : index
    %c0_22 = arith.constant 0 : index
    %90 = vector.load %arg2[%c0_20, %c0_21, %c0_22] : memref<1x24x32xbf16, #tpu.memory_space<vmem>>, vector<1x24x32xbf16>
    %91 = vector.shape_cast %90 : vector<1x24x32xbf16> to vector<24x32xbf16>
    %92 = vector.shape_cast %89 : vector<24x32xbf16> to vector<1x24x32xbf16>
    tpu.vector_store %arg2[%c0_20, %c0_21, %c0_22], %92 {strides = array<i32>} : memref<1x24x32xbf16, #tpu.memory_space<vmem>>, vector<1x24x32xbf16>,
    return
  }
  func.func @transform_0(%arg0: i32) -> (i32, i32, i32) {
    %c0_i32 = arith.constant 0 : i32
    %c0_i32_0 = arith.constant 0 : i32
    %c0_i32_1 = arith.constant 0 : i32
    return %arg0, %c0_i32, %c0_i32_0 : i32, i32, i32
  }
  func.func @transform_1(%arg0: i32) -> (i32, i32, i32) {
    %c0_i32 = arith.constant 0 : i32
    %c0_i32_0 = arith.constant 0 : i32
    %c0_i32_1 = arith.constant 0 : i32
    return %arg0, %c0_i32, %c0_i32_0 : i32, i32, i32
  }
}

module attributes {stable_mosaic.version = 11 : i64} {
  func.func @_ln_matmul_kernel(%arg0: i32, %arg1: i32, %arg2: memref<48x32xbf16, #tpu.memory_space<vmem>>, %arg3: memref<1x32xf32, #tpu.memory_space<vmem>>, %arg4: memref<1x32xf32, #tpu.memory_space<vmem>>, %arg5: memref<32x96xbf16, #tpu.memory_space<vmem>>, %arg6: memref<1x96xf32, #tpu.memory_space<vmem>>, %arg7: memref<48x96xbf16, #tpu.memory_space<vmem>>) attributes {dimension_semantics = [#tpu.dimension_semantics<parallel>, #tpu.dimension_semantics<parallel>], iteration_bounds = array<i64: 1, 1>, scalar_prefetch = 0 : i64, scratch_operands = 0 : i64, tpu.core_type = #tpu.core_type<tc>, window_params = [{transform_indices = @transform_0, window_bounds = array<i64: 48, 32>}, {pipeline_mode = #tpu.pipeline_mode<synchronous>, transform_indices = @transform_1, window_bounds = array<i64: 1, 32>}, {pipeline_mode = #tpu.pipeline_mode<synchronous>, transform_indices = @transform_2, window_bounds = array<i64: 1, 32>}, {transform_indices = @transform_3, window_bounds = array<i64: 32, 96>}, {transform_indices = @transform_4, window_bounds = array<i64: 1, 96>}, {transform_indices = @transform_5, window_bounds = array<i64: 48, 96>}]} {
    %c0 = arith.constant 0 : index
    %c0_0 = arith.constant 0 : index
    %0 = vector.load %arg2[%c0, %c0_0] : memref<48x32xbf16, #tpu.memory_space<vmem>>, vector<48x32xbf16>
    %1 = arith.extf %0 : vector<48x32xbf16> to vector<48x32xf32>
    %cst = arith.constant dense<0.000000e+00> : vector<48xf32>
    %2 = vector.multi_reduction <add>, %1, %cst [1] : vector<48x32xf32> to vector<48xf32>
    %3 = vector.shape_cast %2 : vector<48xf32> to vector<48x1xf32>
    %cst_1 = arith.constant 3.200000e+01 : f32
    %4 = vector.broadcast %cst_1 : f32 to vector<48x1xf32>
    %5 = arith.divf %3, %4 : vector<48x1xf32>
    %6 = vector.broadcast %5 : vector<48x1xf32> to vector<48x32xf32>
    %7 = arith.subf %1, %6 : vector<48x32xf32>
    %8 = arith.mulf %7, %7 : vector<48x32xf32>
    %cst_2 = arith.constant dense<0.000000e+00> : vector<48xf32>
    %9 = vector.multi_reduction <add>, %8, %cst_2 [1] : vector<48x32xf32> to vector<48xf32>
    %10 = vector.shape_cast %9 : vector<48xf32> to vector<48x1xf32>
    %cst_3 = arith.constant 3.200000e+01 : f32
    %11 = vector.broadcast %cst_3 : f32 to vector<48x1xf32>
    %12 = arith.divf %10, %11 : vector<48x1xf32>
    %13 = vector.broadcast %5 : vector<48x1xf32> to vector<48x32xf32>
    %14 = arith.subf %1, %13 : vector<48x32xf32>
    %cst_4 = arith.constant 9.99999997E-7 : f32
    %15 = vector.broadcast %cst_4 : f32 to vector<48x1xf32>
    %16 = arith.addf %12, %15 : vector<48x1xf32>
    %17 = math.rsqrt %16 : vector<48x1xf32>
    %18 = vector.broadcast %17 : vector<48x1xf32> to vector<48x32xf32>
    %19 = arith.mulf %14, %18 : vector<48x32xf32>
    %c0_5 = arith.constant 0 : index
    %c0_6 = arith.constant 0 : index
    %20 = vector.load %arg3[%c0_5, %c0_6] : memref<1x32xf32, #tpu.memory_space<vmem>>, vector<1x32xf32>
    %21 = vector.broadcast %20 : vector<1x32xf32> to vector<48x32xf32>
    %22 = arith.mulf %19, %21 : vector<48x32xf32>
    %c0_7 = arith.constant 0 : index
    %c0_8 = arith.constant 0 : index
    %23 = vector.load %arg4[%c0_7, %c0_8] : memref<1x32xf32, #tpu.memory_space<vmem>>, vector<1x32xf32>
    %24 = vector.broadcast %23 : vector<1x32xf32> to vector<48x32xf32>
    %25 = arith.addf %22, %24 : vector<48x32xf32>
    %26 = arith.truncf %25 : vector<48x32xf32> to vector<48x32xbf16>
    %c0_9 = arith.constant 0 : index
    %c0_10 = arith.constant 0 : index
    %27 = vector.load %arg5[%c0_9, %c0_10] : memref<32x96xbf16, #tpu.memory_space<vmem>>, vector<32x96xbf16>
    %cst_11 = arith.constant dense<0.000000e+00> : vector<48x96xf32>
    %28 = tpu.matmul %26, %27, %cst_11 {dimension_numbers = #tpu.dot_dimension_numbers<[1], [0], [0], [1], [0, 0, 1, 1], [], []>} : vector<48x32xbf16>, vector<32x96xbf16>, vector<48x96xf32> -> vector<48x96xf32>
    %c0_12 = arith.constant 0 : index
    %c0_13 = arith.constant 0 : index
    %29 = vector.load %arg6[%c0_12, %c0_13] : memref<1x96xf32, #tpu.memory_space<vmem>>, vector<1x96xf32>
    %30 = vector.broadcast %29 : vector<1x96xf32> to vector<48x96xf32>
    %31 = arith.addf %28, %30 : vector<48x96xf32>
    %32 = arith.truncf %31 : vector<48x96xf32> to vector<48x96xbf16>
    %c0_14 = arith.constant 0 : index
    %c0_15 = arith.constant 0 : index
    %33 = vector.load %arg7[%c0_14, %c0_15] : memref<48x96xbf16, #tpu.memory_space<vmem>>, vector<48x96xbf16>
    tpu.vector_store %arg7[%c0_14, %c0_15], %32 {strides = array<i32>} : memref<48x96xbf16, #tpu.memory_space<vmem>>, vector<48x96xbf16>,
    return
  }
  func.func @transform_0(%arg0: i32, %arg1: i32) -> (i32, i32) {
    %c0_i32 = arith.constant 0 : i32
    %c0_i32_0 = arith.constant 0 : i32
    return %arg0, %c0_i32 : i32, i32
  }
  func.func @transform_1(%arg0: i32, %arg1: i32) -> (i32, i32) {
    %c0_i32 = arith.constant 0 : i32
    %c0_i32_0 = arith.constant 0 : i32
    %c0_i32_1 = arith.constant 0 : i32
    return %c0_i32, %c0_i32_0 : i32, i32
  }
  func.func @transform_2(%arg0: i32, %arg1: i32) -> (i32, i32) {
    %c0_i32 = arith.constant 0 : i32
    %c0_i32_0 = arith.constant 0 : i32
    %c0_i32_1 = arith.constant 0 : i32
    return %c0_i32, %c0_i32_0 : i32, i32
  }
  func.func @transform_3(%arg0: i32, %arg1: i32) -> (i32, i32) {
    %c0_i32 = arith.constant 0 : i32
    %c0_i32_0 = arith.constant 0 : i32
    return %c0_i32, %arg1 : i32, i32
  }
  func.func @transform_4(%arg0: i32, %arg1: i32) -> (i32, i32) {
    %c0_i32 = arith.constant 0 : i32
    %c0_i32_0 = arith.constant 0 : i32
    return %c0_i32, %arg1 : i32, i32
  }
  func.func @transform_5(%arg0: i32, %arg1: i32) -> (i32, i32) {
    %c0_i32 = arith.constant 0 : i32
    return %arg0, %arg1 : i32, i32
  }
}

module attributes {stable_mosaic.version = 11 : i64} {
  func.func @_matmul_kernel(%arg0: i32, %arg1: i32, %arg2: i32, %arg3: memref<48x32xbf16, #tpu.memory_space<vmem>>, %arg4: memref<32x32xbf16, #tpu.memory_space<vmem>>, %arg5: memref<1x32xf32, #tpu.memory_space<vmem>>, %arg6: memref<48x32xbf16, #tpu.memory_space<vmem>>, %arg7: memref<48x32xbf16, #tpu.memory_space<vmem>>, %arg8: memref<48x32xf32, #tpu.memory_space<vmem>>) attributes {dimension_semantics = [#tpu.dimension_semantics<parallel>, #tpu.dimension_semantics<parallel>, #tpu.dimension_semantics<arbitrary>], iteration_bounds = array<i64: 1, 1, 1>, scalar_prefetch = 0 : i64, scratch_operands = 1 : i64, tpu.core_type = #tpu.core_type<tc>, window_params = [{transform_indices = @transform_0, window_bounds = array<i64: 48, 32>}, {transform_indices = @transform_1, window_bounds = array<i64: 32, 32>}, {transform_indices = @transform_2, window_bounds = array<i64: 1, 32>}, {transform_indices = @transform_3, window_bounds = array<i64: 48, 32>}, {transform_indices = @transform_4, window_bounds = array<i64: 48, 32>}]} {
    %c0_i32 = arith.constant 0 : i32
    %0 = arith.cmpi eq, %arg2, %c0_i32 : i32
    %1 = arith.extui %0 : i1 to i32
    %c0_i32_0 = arith.constant 0 : i32
    %2 = arith.cmpi ne, %1, %c0_i32_0 : i32
    scf.if %2 {
      %cst_10 = arith.constant 0.000000e+00 : f32
      %12 = vector.broadcast %cst_10 : f32 to vector<48x32xf32>
      %c0_11 = arith.constant 0 : index
      %c0_12 = arith.constant 0 : index
      %13 = vector.load %arg8[%c0_11, %c0_12] : memref<48x32xf32, #tpu.memory_space<vmem>>, vector<48x32xf32>
      tpu.vector_store %arg8[%c0_11, %c0_12], %12 {strides = array<i32>} : memref<48x32xf32, #tpu.memory_space<vmem>>, vector<48x32xf32>,
    } else {
    }
    %c0 = arith.constant 0 : index
    %c0_1 = arith.constant 0 : index
    %3 = vector.load %arg8[%c0, %c0_1] : memref<48x32xf32, #tpu.memory_space<vmem>>, vector<48x32xf32>
    %c0_2 = arith.constant 0 : index
    %c0_3 = arith.constant 0 : index
    %4 = vector.load %arg3[%c0_2, %c0_3] : memref<48x32xbf16, #tpu.memory_space<vmem>>, vector<48x32xbf16>
    %c0_4 = arith.constant 0 : index
    %c0_5 = arith.constant 0 : index
    %5 = vector.load %arg4[%c0_4, %c0_5] : memref<32x32xbf16, #tpu.memory_space<vmem>>, vector<32x32xbf16>
    %cst = arith.constant dense<0.000000e+00> : vector<48x32xf32>
    %6 = tpu.matmul %4, %5, %cst {dimension_numbers = #tpu.dot_dimension_numbers<[1], [0], [0], [1], [0, 0, 1, 1], [], []>} : vector<48x32xbf16>, vector<32x32xbf16>, vector<48x32xf32> -> vector<48x32xf32>
    %7 = arith.addf %3, %6 : vector<48x32xf32>
    %c0_6 = arith.constant 0 : index
    %c0_7 = arith.constant 0 : index
    %8 = vector.load %arg8[%c0_6, %c0_7] : memref<48x32xf32, #tpu.memory_space<vmem>>, vector<48x32xf32>
    tpu.vector_store %arg8[%c0_6, %c0_7], %7 {strides = array<i32>} : memref<48x32xf32, #tpu.memory_space<vmem>>, vector<48x32xf32>,
    %c0_i32_8 = arith.constant 0 : i32
    %9 = arith.cmpi eq, %arg2, %c0_i32_8 : i32
    %10 = arith.extui %9 : i1 to i32
    %c0_i32_9 = arith.constant 0 : i32
    %11 = arith.cmpi ne, %10, %c0_i32_9 : i32
    scf.if %11 {
      %c0_10 = arith.constant 0 : index
      %c0_11 = arith.constant 0 : index
      %12 = vector.load %arg8[%c0_10, %c0_11] : memref<48x32xf32, #tpu.memory_space<vmem>>, vector<48x32xf32>
      %c0_12 = arith.constant 0 : index
      %c0_13 = arith.constant 0 : index
      %13 = vector.load %arg5[%c0_12, %c0_13] : memref<1x32xf32, #tpu.memory_space<vmem>>, vector<1x32xf32>
      %14 = vector.broadcast %13 : vector<1x32xf32> to vector<48x32xf32>
      %15 = arith.addf %12, %14 : vector<48x32xf32>
      %c0_14 = arith.constant 0 : index
      %c0_15 = arith.constant 0 : index
      %16 = vector.load %arg6[%c0_14, %c0_15] : memref<48x32xbf16, #tpu.memory_space<vmem>>, vector<48x32xbf16>
      %17 = arith.extf %16 : vector<48x32xbf16> to vector<48x32xf32>
      %18 = arith.addf %15, %17 : vector<48x32xf32>
      %19 = arith.truncf %18 : vector<48x32xf32> to vector<48x32xbf16>
      %c0_16 = arith.constant 0 : index
      %c0_17 = arith.constant 0 : index
      %20 = vector.load %arg7[%c0_16, %c0_17] : memref<48x32xbf16, #tpu.memory_space<vmem>>, vector<48x32xbf16>
      tpu.vector_store %arg7[%c0_16, %c0_17], %19 {strides = array<i32>} : memref<48x32xbf16, #tpu.memory_space<vmem>>, vector<48x32xbf16>,
    } else {
    }
    return
  }
  func.func @transform_0(%arg0: i32, %arg1: i32, %arg2: i32) -> (i32, i32) {
    %c0_i32 = arith.constant 0 : i32
    return %arg0, %arg2 : i32, i32
  }
  func.func @transform_1(%arg0: i32, %arg1: i32, %arg2: i32) -> (i32, i32) {
    %c0_i32 = arith.constant 0 : i32
    return %arg2, %arg1 : i32, i32
  }
  func.func @transform_2(%arg0: i32, %arg1: i32, %arg2: i32) -> (i32, i32) {
    %c0_i32 = arith.constant 0 : i32
    %c0_i32_0 = arith.constant 0 : i32
    return %c0_i32, %arg1 : i32, i32
  }
  func.func @transform_3(%arg0: i32, %arg1: i32, %arg2: i32) -> (i32, i32) {
    %c0_i32 = arith.constant 0 : i32
    return %arg0, %arg1 : i32, i32
  }
  func.func @transform_4(%arg0: i32, %arg1: i32, %arg2: i32) -> (i32, i32) {
    %c0_i32 = arith.constant 0 : i32
    return %arg0, %arg1 : i32, i32
  }
}

module attributes {stable_mosaic.version = 11 : i64} {
  func.func @_matmul_kernel(%arg0: i32, %arg1: i32, %arg2: i32, %arg3: memref<48x128xbf16, #tpu.memory_space<vmem>>, %arg4: memref<128x32xbf16, #tpu.memory_space<vmem>>, %arg5: memref<1x32xf32, #tpu.memory_space<vmem>>, %arg6: memref<48x32xbf16, #tpu.memory_space<vmem>>, %arg7: memref<48x32xbf16, #tpu.memory_space<vmem>>, %arg8: memref<48x32xf32, #tpu.memory_space<vmem>>) attributes {dimension_semantics = [#tpu.dimension_semantics<parallel>, #tpu.dimension_semantics<parallel>, #tpu.dimension_semantics<arbitrary>], iteration_bounds = array<i64: 1, 1, 1>, scalar_prefetch = 0 : i64, scratch_operands = 1 : i64, tpu.core_type = #tpu.core_type<tc>, window_params = [{transform_indices = @transform_0, window_bounds = array<i64: 48, 128>}, {transform_indices = @transform_1, window_bounds = array<i64: 128, 32>}, {transform_indices = @transform_2, window_bounds = array<i64: 1, 32>}, {transform_indices = @transform_3, window_bounds = array<i64: 48, 32>}, {transform_indices = @transform_4, window_bounds = array<i64: 48, 32>}]} {
    %c0_i32 = arith.constant 0 : i32
    %0 = arith.cmpi eq, %arg2, %c0_i32 : i32
    %1 = arith.extui %0 : i1 to i32
    %c0_i32_0 = arith.constant 0 : i32
    %2 = arith.cmpi ne, %1, %c0_i32_0 : i32
    scf.if %2 {
      %cst_10 = arith.constant 0.000000e+00 : f32
      %12 = vector.broadcast %cst_10 : f32 to vector<48x32xf32>
      %c0_11 = arith.constant 0 : index
      %c0_12 = arith.constant 0 : index
      %13 = vector.load %arg8[%c0_11, %c0_12] : memref<48x32xf32, #tpu.memory_space<vmem>>, vector<48x32xf32>
      tpu.vector_store %arg8[%c0_11, %c0_12], %12 {strides = array<i32>} : memref<48x32xf32, #tpu.memory_space<vmem>>, vector<48x32xf32>,
    } else {
    }
    %c0 = arith.constant 0 : index
    %c0_1 = arith.constant 0 : index
    %3 = vector.load %arg8[%c0, %c0_1] : memref<48x32xf32, #tpu.memory_space<vmem>>, vector<48x32xf32>
    %c0_2 = arith.constant 0 : index
    %c0_3 = arith.constant 0 : index
    %4 = vector.load %arg3[%c0_2, %c0_3] : memref<48x128xbf16, #tpu.memory_space<vmem>>, vector<48x128xbf16>
    %c0_4 = arith.constant 0 : index
    %c0_5 = arith.constant 0 : index
    %5 = vector.load %arg4[%c0_4, %c0_5] : memref<128x32xbf16, #tpu.memory_space<vmem>>, vector<128x32xbf16>
    %cst = arith.constant dense<0.000000e+00> : vector<48x32xf32>
    %6 = tpu.matmul %4, %5, %cst {dimension_numbers = #tpu.dot_dimension_numbers<[1], [0], [0], [1], [0, 0, 1, 1], [], []>} : vector<48x128xbf16>, vector<128x32xbf16>, vector<48x32xf32> -> vector<48x32xf32>
    %7 = arith.addf %3, %6 : vector<48x32xf32>
    %c0_6 = arith.constant 0 : index
    %c0_7 = arith.constant 0 : index
    %8 = vector.load %arg8[%c0_6, %c0_7] : memref<48x32xf32, #tpu.memory_space<vmem>>, vector<48x32xf32>
    tpu.vector_store %arg8[%c0_6, %c0_7], %7 {strides = array<i32>} : memref<48x32xf32, #tpu.memory_space<vmem>>, vector<48x32xf32>,
    %c0_i32_8 = arith.constant 0 : i32
    %9 = arith.cmpi eq, %arg2, %c0_i32_8 : i32
    %10 = arith.extui %9 : i1 to i32
    %c0_i32_9 = arith.constant 0 : i32
    %11 = arith.cmpi ne, %10, %c0_i32_9 : i32
    scf.if %11 {
      %c0_10 = arith.constant 0 : index
      %c0_11 = arith.constant 0 : index
      %12 = vector.load %arg8[%c0_10, %c0_11] : memref<48x32xf32, #tpu.memory_space<vmem>>, vector<48x32xf32>
      %c0_12 = arith.constant 0 : index
      %c0_13 = arith.constant 0 : index
      %13 = vector.load %arg5[%c0_12, %c0_13] : memref<1x32xf32, #tpu.memory_space<vmem>>, vector<1x32xf32>
      %14 = vector.broadcast %13 : vector<1x32xf32> to vector<48x32xf32>
      %15 = arith.addf %12, %14 : vector<48x32xf32>
      %c0_14 = arith.constant 0 : index
      %c0_15 = arith.constant 0 : index
      %16 = vector.load %arg6[%c0_14, %c0_15] : memref<48x32xbf16, #tpu.memory_space<vmem>>, vector<48x32xbf16>
      %17 = arith.extf %16 : vector<48x32xbf16> to vector<48x32xf32>
      %18 = arith.addf %15, %17 : vector<48x32xf32>
      %19 = arith.truncf %18 : vector<48x32xf32> to vector<48x32xbf16>
      %c0_16 = arith.constant 0 : index
      %c0_17 = arith.constant 0 : index
      %20 = vector.load %arg7[%c0_16, %c0_17] : memref<48x32xbf16, #tpu.memory_space<vmem>>, vector<48x32xbf16>
      tpu.vector_store %arg7[%c0_16, %c0_17], %19 {strides = array<i32>} : memref<48x32xbf16, #tpu.memory_space<vmem>>, vector<48x32xbf16>,
    } else {
    }
    return
  }
  func.func @transform_0(%arg0: i32, %arg1: i32, %arg2: i32) -> (i32, i32) {
    %c0_i32 = arith.constant 0 : i32
    return %arg0, %arg2 : i32, i32
  }
  func.func @transform_1(%arg0: i32, %arg1: i32, %arg2: i32) -> (i32, i32) {
    %c0_i32 = arith.constant 0 : i32
    return %arg2, %arg1 : i32, i32
  }
  func.func @transform_2(%arg0: i32, %arg1: i32, %arg2: i32) -> (i32, i32) {
    %c0_i32 = arith.constant 0 : i32
    %c0_i32_0 = arith.constant 0 : i32
    return %c0_i32, %arg1 : i32, i32
  }
  func.func @transform_3(%arg0: i32, %arg1: i32, %arg2: i32) -> (i32, i32) {
    %c0_i32 = arith.constant 0 : i32
    return %arg0, %arg1 : i32, i32
  }
  func.func @transform_4(%arg0: i32, %arg1: i32, %arg2: i32) -> (i32, i32) {
    %c0_i32 = arith.constant 0 : i32
    return %arg0, %arg1 : i32, i32
  }
}

module attributes {stable_mosaic.version = 11 : i64} {
  func.func @_ln_matmul_kernel(%arg0: i32, %arg1: i32, %arg2: memref<48x32xbf16, #tpu.memory_space<vmem>>, %arg3: memref<1x32xf32, #tpu.memory_space<vmem>>, %arg4: memref<1x32xf32, #tpu.memory_space<vmem>>, %arg5: memref<32x128xbf16, #tpu.memory_space<vmem>>, %arg6: memref<1x128xf32, #tpu.memory_space<vmem>>, %arg7: memref<48x128xbf16, #tpu.memory_space<vmem>>) attributes {dimension_semantics = [#tpu.dimension_semantics<parallel>, #tpu.dimension_semantics<parallel>], iteration_bounds = array<i64: 1, 1>, scalar_prefetch = 0 : i64, scratch_operands = 0 : i64, tpu.core_type = #tpu.core_type<tc>, window_params = [{transform_indices = @transform_0, window_bounds = array<i64: 48, 32>}, {pipeline_mode = #tpu.pipeline_mode<synchronous>, transform_indices = @transform_1, window_bounds = array<i64: 1, 32>}, {pipeline_mode = #tpu.pipeline_mode<synchronous>, transform_indices = @transform_2, window_bounds = array<i64: 1, 32>}, {transform_indices = @transform_3, window_bounds = array<i64: 32, 128>}, {transform_indices = @transform_4, window_bounds = array<i64: 1, 128>}, {transform_indices = @transform_5, window_bounds = array<i64: 48, 128>}]} {
    %c0 = arith.constant 0 : index
    %c0_0 = arith.constant 0 : index
    %0 = vector.load %arg2[%c0, %c0_0] : memref<48x32xbf16, #tpu.memory_space<vmem>>, vector<48x32xbf16>
    %1 = arith.extf %0 : vector<48x32xbf16> to vector<48x32xf32>
    %cst = arith.constant dense<0.000000e+00> : vector<48xf32>
    %2 = vector.multi_reduction <add>, %1, %cst [1] : vector<48x32xf32> to vector<48xf32>
    %3 = vector.shape_cast %2 : vector<48xf32> to vector<48x1xf32>
    %cst_1 = arith.constant 3.200000e+01 : f32
    %4 = vector.broadcast %cst_1 : f32 to vector<48x1xf32>
    %5 = arith.divf %3, %4 : vector<48x1xf32>
    %6 = vector.broadcast %5 : vector<48x1xf32> to vector<48x32xf32>
    %7 = arith.subf %1, %6 : vector<48x32xf32>
    %8 = arith.mulf %7, %7 : vector<48x32xf32>
    %cst_2 = arith.constant dense<0.000000e+00> : vector<48xf32>
    %9 = vector.multi_reduction <add>, %8, %cst_2 [1] : vector<48x32xf32> to vector<48xf32>
    %10 = vector.shape_cast %9 : vector<48xf32> to vector<48x1xf32>
    %cst_3 = arith.constant 3.200000e+01 : f32
    %11 = vector.broadcast %cst_3 : f32 to vector<48x1xf32>
    %12 = arith.divf %10, %11 : vector<48x1xf32>
    %13 = vector.broadcast %5 : vector<48x1xf32> to vector<48x32xf32>
    %14 = arith.subf %1, %13 : vector<48x32xf32>
    %cst_4 = arith.constant 9.99999997E-7 : f32
    %15 = vector.broadcast %cst_4 : f32 to vector<48x1xf32>
    %16 = arith.addf %12, %15 : vector<48x1xf32>
    %17 = math.rsqrt %16 : vector<48x1xf32>
    %18 = vector.broadcast %17 : vector<48x1xf32> to vector<48x32xf32>
    %19 = arith.mulf %14, %18 : vector<48x32xf32>
    %c0_5 = arith.constant 0 : index
    %c0_6 = arith.constant 0 : index
    %20 = vector.load %arg3[%c0_5, %c0_6] : memref<1x32xf32, #tpu.memory_space<vmem>>, vector<1x32xf32>
    %21 = vector.broadcast %20 : vector<1x32xf32> to vector<48x32xf32>
    %22 = arith.mulf %19, %21 : vector<48x32xf32>
    %c0_7 = arith.constant 0 : index
    %c0_8 = arith.constant 0 : index
    %23 = vector.load %arg4[%c0_7, %c0_8] : memref<1x32xf32, #tpu.memory_space<vmem>>, vector<1x32xf32>
    %24 = vector.broadcast %23 : vector<1x32xf32> to vector<48x32xf32>
    %25 = arith.addf %22, %24 : vector<48x32xf32>
    %26 = arith.truncf %25 : vector<48x32xf32> to vector<48x32xbf16>
    %c0_9 = arith.constant 0 : index
    %c0_10 = arith.constant 0 : index
    %27 = vector.load %arg5[%c0_9, %c0_10] : memref<32x128xbf16, #tpu.memory_space<vmem>>, vector<32x128xbf16>
    %cst_11 = arith.constant dense<0.000000e+00> : vector<48x128xf32>
    %28 = tpu.matmul %26, %27, %cst_11 {dimension_numbers = #tpu.dot_dimension_numbers<[1], [0], [0], [1], [0, 0, 1, 1], [], []>} : vector<48x32xbf16>, vector<32x128xbf16>, vector<48x128xf32> -> vector<48x128xf32>
    %c0_12 = arith.constant 0 : index
    %c0_13 = arith.constant 0 : index
    %29 = vector.load %arg6[%c0_12, %c0_13] : memref<1x128xf32, #tpu.memory_space<vmem>>, vector<1x128xf32>
    %30 = vector.broadcast %29 : vector<1x128xf32> to vector<48x128xf32>
    %31 = arith.addf %28, %30 : vector<48x128xf32>
    %32 = arith.mulf %31, %31 : vector<48x128xf32>
    %33 = arith.mulf %31, %32 : vector<48x128xf32>
    %cst_14 = arith.constant 4.471500e-02 : f32
    %34 = vector.broadcast %cst_14 : f32 to vector<48x128xf32>
    %35 = arith.mulf %34, %33 : vector<48x128xf32>
    %36 = arith.addf %31, %35 : vector<48x128xf32>
    %cst_15 = arith.constant 0.797884583 : f32
    %37 = vector.broadcast %cst_15 : f32 to vector<48x128xf32>
    %38 = arith.mulf %37, %36 : vector<48x128xf32>
    %39 = math.tanh %38 : vector<48x128xf32>
    %cst_16 = arith.constant 1.000000e+00 : f32
    %40 = vector.broadcast %cst_16 : f32 to vector<48x128xf32>
    %41 = arith.addf %40, %39 : vector<48x128xf32>
    %cst_17 = arith.constant 5.000000e-01 : f32
    %42 = vector.broadcast %cst_17 : f32 to vector<48x128xf32>
    %43 = arith.mulf %42, %41 : vector<48x128xf32>
    %44 = arith.mulf %31, %43 : vector<48x128xf32>
    %45 = arith.truncf %44 : vector<48x128xf32> to vector<48x128xbf16>
    %c0_18 = arith.constant 0 : index
    %c0_19 = arith.constant 0 : index
    %46 = vector.load %arg7[%c0_18, %c0_19] : memref<48x128xbf16, #tpu.memory_space<vmem>>, vector<48x128xbf16>
    tpu.vector_store %arg7[%c0_18, %c0_19], %45 {strides = array<i32>} : memref<48x128xbf16, #tpu.memory_space<vmem>>, vector<48x128xbf16>,
    return
  }
  func.func @transform_0(%arg0: i32, %arg1: i32) -> (i32, i32) {
    %c0_i32 = arith.constant 0 : i32
    %c0_i32_0 = arith.constant 0 : i32
    return %arg0, %c0_i32 : i32, i32
  }
  func.func @transform_1(%arg0: i32, %arg1: i32) -> (i32, i32) {
    %c0_i32 = arith.constant 0 : i32
    %c0_i32_0 = arith.constant 0 : i32
    %c0_i32_1 = arith.constant 0 : i32
    return %c0_i32, %c0_i32_0 : i32, i32
  }
  func.func @transform_2(%arg0: i32, %arg1: i32) -> (i32, i32) {
    %c0_i32 = arith.constant 0 : i32
    %c0_i32_0 = arith.constant 0 : i32
    %c0_i32_1 = arith.constant 0 : i32
    return %c0_i32, %c0_i32_0 : i32, i32
  }
  func.func @transform_3(%arg0: i32, %arg1: i32) -> (i32, i32) {
    %c0_i32 = arith.constant 0 : i32
    %c0_i32_0 = arith.constant 0 : i32
    return %c0_i32, %arg1 : i32, i32
  }
  func.func @transform_4(%arg0: i32, %arg1: i32) -> (i32, i32) {
    %c0_i32 = arith.constant 0 : i32
    %c0_i32_0 = arith.constant 0 : i32
    return %c0_i32, %arg1 : i32, i32
  }
  func.func @transform_5(%arg0: i32, %arg1: i32) -> (i32, i32) {
    %c0_i32 = arith.constant 0 : i32
    return %arg0, %arg1 : i32, i32
  }
}

module attributes {stable_mosaic.version = 11 : i64} {
  func.func @_cls_head_kernel(%arg0: i32, %arg1: memref<2x32xf32, #tpu.memory_space<vmem>>, %arg2: memref<1x32xf32, #tpu.memory_space<vmem>>, %arg3: memref<1x32xf32, #tpu.memory_space<vmem>>, %arg4: memref<1x32xf32, #tpu.memory_space<vmem>>, %arg5: memref<1x32xf32, #tpu.memory_space<vmem>>, %arg6: memref<2x32xf32, #tpu.memory_space<vmem>>, %arg7: memref<2x32xf32, #tpu.memory_space<vmem>>) attributes {dimension_semantics = [#tpu.dimension_semantics<arbitrary>], iteration_bounds = array<i64: 1>, scalar_prefetch = 0 : i64, scratch_operands = 0 : i64, tpu.core_type = #tpu.core_type<tc>, window_params = [{pipeline_mode = #tpu.pipeline_mode<synchronous>, transform_indices = @transform_0, window_bounds = array<i64: 2, 32>}, {pipeline_mode = #tpu.pipeline_mode<synchronous>, transform_indices = @transform_1, window_bounds = array<i64: 1, 32>}, {pipeline_mode = #tpu.pipeline_mode<synchronous>, transform_indices = @transform_2, window_bounds = array<i64: 1, 32>}, {pipeline_mode = #tpu.pipeline_mode<synchronous>, transform_indices = @transform_3, window_bounds = array<i64: 1, 32>}, {pipeline_mode = #tpu.pipeline_mode<synchronous>, transform_indices = @transform_4, window_bounds = array<i64: 1, 32>}, {pipeline_mode = #tpu.pipeline_mode<synchronous>, transform_indices = @transform_5, window_bounds = array<i64: 2, 32>}, {pipeline_mode = #tpu.pipeline_mode<synchronous>, transform_indices = @transform_6, window_bounds = array<i64: 2, 32>}]} {
    %c0 = arith.constant 0 : index
    %c0_0 = arith.constant 0 : index
    %0 = vector.load %arg1[%c0, %c0_0] : memref<2x32xf32, #tpu.memory_space<vmem>>, vector<2x32xf32>
    %cst = arith.constant dense<0.000000e+00> : vector<2xf32>
    %1 = vector.multi_reduction <add>, %0, %cst [1] : vector<2x32xf32> to vector<2xf32>
    %2 = vector.shape_cast %1 : vector<2xf32> to vector<2x1xf32>
    %cst_1 = arith.constant 3.200000e+01 : f32
    %3 = vector.broadcast %cst_1 : f32 to vector<2x1xf32>
    %4 = arith.divf %2, %3 : vector<2x1xf32>
    %5 = vector.broadcast %4 : vector<2x1xf32> to vector<2x32xf32>
    %6 = arith.subf %0, %5 : vector<2x32xf32>
    %7 = arith.mulf %6, %6 : vector<2x32xf32>
    %cst_2 = arith.constant dense<0.000000e+00> : vector<2xf32>
    %8 = vector.multi_reduction <add>, %7, %cst_2 [1] : vector<2x32xf32> to vector<2xf32>
    %9 = vector.shape_cast %8 : vector<2xf32> to vector<2x1xf32>
    %cst_3 = arith.constant 3.200000e+01 : f32
    %10 = vector.broadcast %cst_3 : f32 to vector<2x1xf32>
    %11 = arith.divf %9, %10 : vector<2x1xf32>
    %12 = vector.broadcast %4 : vector<2x1xf32> to vector<2x32xf32>
    %13 = arith.subf %0, %12 : vector<2x32xf32>
    %cst_4 = arith.constant 9.99999997E-7 : f32
    %14 = vector.broadcast %cst_4 : f32 to vector<2x1xf32>
    %15 = arith.addf %11, %14 : vector<2x1xf32>
    %16 = math.rsqrt %15 : vector<2x1xf32>
    %17 = vector.broadcast %16 : vector<2x1xf32> to vector<2x32xf32>
    %18 = arith.mulf %13, %17 : vector<2x32xf32>
    %c0_5 = arith.constant 0 : index
    %c0_6 = arith.constant 0 : index
    %19 = vector.load %arg2[%c0_5, %c0_6] : memref<1x32xf32, #tpu.memory_space<vmem>>, vector<1x32xf32>
    %20 = vector.broadcast %19 : vector<1x32xf32> to vector<2x32xf32>
    %21 = arith.mulf %18, %20 : vector<2x32xf32>
    %c0_7 = arith.constant 0 : index
    %c0_8 = arith.constant 0 : index
    %22 = vector.load %arg3[%c0_7, %c0_8] : memref<1x32xf32, #tpu.memory_space<vmem>>, vector<1x32xf32>
    %23 = vector.broadcast %22 : vector<1x32xf32> to vector<2x32xf32>
    %24 = arith.addf %21, %23 : vector<2x32xf32>
    %c0_9 = arith.constant 0 : index
    %c0_10 = arith.constant 0 : index
    %25 = vector.load %arg6[%c0_9, %c0_10] : memref<2x32xf32, #tpu.memory_space<vmem>>, vector<2x32xf32>
    tpu.vector_store %arg6[%c0_9, %c0_10], %24 {strides = array<i32>} : memref<2x32xf32, #tpu.memory_space<vmem>>, vector<2x32xf32>,
    %cst_11 = arith.constant dense<0.000000e+00> : vector<32xf32>
    %26 = vector.multi_reduction <add>, %24, %cst_11 [0] : vector<2x32xf32> to vector<32xf32>
    %27 = vector.shape_cast %26 : vector<32xf32> to vector<1x32xf32>
    %cst_12 = arith.constant 2.000000e+00 : f32
    %28 = vector.broadcast %cst_12 : f32 to vector<1x32xf32>
    %29 = arith.divf %27, %28 : vector<1x32xf32>
    %30 = vector.broadcast %29 : vector<1x32xf32> to vector<2x32xf32>
    %31 = arith.subf %24, %30 : vector<2x32xf32>
    %32 = arith.mulf %31, %31 : vector<2x32xf32>
    %cst_13 = arith.constant dense<0.000000e+00> : vector<32xf32>
    %33 = vector.multi_reduction <add>, %32, %cst_13 [0] : vector<2x32xf32> to vector<32xf32>
    %34 = vector.shape_cast %33 : vector<32xf32> to vector<1x32xf32>
    %cst_14 = arith.constant 2.000000e+00 : f32
    %35 = vector.broadcast %cst_14 : f32 to vector<1x32xf32>
    %36 = arith.divf %34, %35 : vector<1x32xf32>
    %37 = vector.broadcast %29 : vector<1x32xf32> to vector<2x32xf32>
    %38 = arith.subf %24, %37 : vector<2x32xf32>
    %cst_15 = arith.constant 9.99999974E-6 : f32
    %39 = vector.broadcast %cst_15 : f32 to vector<1x32xf32>
    %40 = arith.addf %36, %39 : vector<1x32xf32>
    %41 = math.rsqrt %40 : vector<1x32xf32>
    %42 = vector.broadcast %41 : vector<1x32xf32> to vector<2x32xf32>
    %43 = arith.mulf %38, %42 : vector<2x32xf32>
    %c0_16 = arith.constant 0 : index
    %c0_17 = arith.constant 0 : index
    %44 = vector.load %arg4[%c0_16, %c0_17] : memref<1x32xf32, #tpu.memory_space<vmem>>, vector<1x32xf32>
    %45 = vector.broadcast %44 : vector<1x32xf32> to vector<2x32xf32>
    %46 = arith.mulf %43, %45 : vector<2x32xf32>
    %c0_18 = arith.constant 0 : index
    %c0_19 = arith.constant 0 : index
    %47 = vector.load %arg5[%c0_18, %c0_19] : memref<1x32xf32, #tpu.memory_space<vmem>>, vector<1x32xf32>
    %48 = vector.broadcast %47 : vector<1x32xf32> to vector<2x32xf32>
    %49 = arith.addf %46, %48 : vector<2x32xf32>
    %c0_20 = arith.constant 0 : index
    %c0_21 = arith.constant 0 : index
    %50 = vector.load %arg7[%c0_20, %c0_21] : memref<2x32xf32, #tpu.memory_space<vmem>>, vector<2x32xf32>
    tpu.vector_store %arg7[%c0_20, %c0_21], %49 {strides = array<i32>} : memref<2x32xf32, #tpu.memory_space<vmem>>, vector<2x32xf32>,
    return
  }
  func.func @transform_0(%arg0: i32) -> (i32, i32) {
    %c0_i32 = arith.constant 0 : i32
    %c0_i32_0 = arith.constant 0 : i32
    %c0_i32_1 = arith.constant 0 : i32
    return %c0_i32, %c0_i32_0 : i32, i32
  }
  func.func @transform_1(%arg0: i32) -> (i32, i32) {
    %c0_i32 = arith.constant 0 : i32
    %c0_i32_0 = arith.constant 0 : i32
    %c0_i32_1 = arith.constant 0 : i32
    return %c0_i32, %c0_i32_0 : i32, i32
  }
  func.func @transform_2(%arg0: i32) -> (i32, i32) {
    %c0_i32 = arith.constant 0 : i32
    %c0_i32_0 = arith.constant 0 : i32
    %c0_i32_1 = arith.constant 0 : i32
    return %c0_i32, %c0_i32_0 : i32, i32
  }
  func.func @transform_3(%arg0: i32) -> (i32, i32) {
    %c0_i32 = arith.constant 0 : i32
    %c0_i32_0 = arith.constant 0 : i32
    %c0_i32_1 = arith.constant 0 : i32
    return %c0_i32, %c0_i32_0 : i32, i32
  }
  func.func @transform_4(%arg0: i32) -> (i32, i32) {
    %c0_i32 = arith.constant 0 : i32
    %c0_i32_0 = arith.constant 0 : i32
    %c0_i32_1 = arith.constant 0 : i32
    return %c0_i32, %c0_i32_0 : i32, i32
  }
  func.func @transform_5(%arg0: i32) -> (i32, i32) {
    %c0_i32 = arith.constant 0 : i32
    %c0_i32_0 = arith.constant 0 : i32
    %c0_i32_1 = arith.constant 0 : i32
    return %c0_i32, %c0_i32_0 : i32, i32
  }
  func.func @transform_6(%arg0: i32) -> (i32, i32) {
    %c0_i32 = arith.constant 0 : i32
    %c0_i32_0 = arith.constant 0 : i32
    %c0_i32_1 = arith.constant 0 : i32
    return %c0_i32, %c0_i32_0 : i32, i32
  }
}

</mosaic_0001>

<bundles_post_ra>
// kernel: build_transformer_forward.13
= control target key start
LH: loop header
LB: loop body
LE: loop exit
PB: predicated region body
PF: predicated region fallthrough
CT: control target
= control target key end

     0   :  { %vm33_vm0 = vcmask 261120   ;;  %v341_v45 = vmov 0.0   ;;  %vm342_vm1 = vmmov 0   ;;  %vm255_vm2 = vcmask 781312   ;;  %s476_s0 = inlined_call_operand.vmem [shape: bf16[48,32], index: 0, kind: input, shape index: {}]   ;;  %s477_s3 = inlined_call_operand.vmem [shape: bf16[32,96], index: 3, kind: input, shape index: {}]   ;;  %s478_s1 = inlined_call_operand.vmem [shape: f32[1,32], index: 1, kind: input, shape index: {}]   ;;  %s479_s2 = inlined_call_operand.vmem [shape: f32[1,32], index: 2, kind: input, shape index: {}]   ;;  %s480_s4 = inlined_call_operand.vmem [shape: f32[1,96], index: 4, kind: input, shape index: {}]   ;;  %s481_s5 = inlined_call_operand.vmem [shape: bf16[48,96], index: 5, kind: output, shape index: {}]  }
   0x1   :  { %v298_v0 = vld [vmem:[%s476_s0 + $0x8] sm:$0xff]   ;;  %v287_v1 = vld [vmem:[%s476_s0] sm:$0xff]   ;;  %v299_v5 = vld [vmem:[%s476_s0 + $0x10] sm:$0xff]   ;;  %321 = vmatprep.subr.bf16.mxu1 %v341_v45  ;;  %305 = vmatprep.subr.bf16.mxu0 %v341_v45 }
   0x2   :  { %v292_v2 = vunpack.c.l.bf16 %v298_v0  ;;  %v293_v3 = vunpack.c.h.bf16 %v298_v0  ;;  %v288_v4 = vunpack.c.l.bf16 %v287_v1  ;;  %v289_v6 = vunpack.c.h.bf16 %v287_v1  ;;  %v327_v46 = vld [vmem:[%s477_s3 + $0x8] sm:$0xff]   ;;  %313 = vmatprep.mubr.msk.bf16.mxu1 %vm342_vm1, %v341_v45  ;;  %309 = vmatprep.mubr.msk.bf16.mxu0 %vm342_vm1, %v341_v45  ;;  %v328_v47 = vld [vmem:[%s477_s3] sm:$0xff]  }
   0x3   :  { %v296_v10 = vunpack.c.l.bf16 %v299_v5  ;;  %v297_v12 = vunpack.c.h.bf16 %v299_v5  ;;  %323 = vmatpush3.bf16.msra.mxu1 %v327_v46  ;;  %306 = vmatpush3.bf16.msra.mxu0 %v327_v46 }
   0x4   :  { %v40_v7 = vsel %vm33_vm0, %v292_v2, 0.0  ;;  %v34_v8 = vsel %vm33_vm0, %v288_v4, 0.0  ;;  %v43_v9 = vsel %vm33_vm0, %v293_v3, 0.0  ;;  %v37_v11 = vsel %vm33_vm0, %v289_v6, 0.0  ;;  %322 = vmatprep.subr.bf16.mxu1 %v341_v45  ;;  %307 = vmatprep.subr.bf16.mxu0 %v341_v45 }
   0x5   :  { %41 = vadd.xlane.f32.xlu0 %v40_v7  ;;  %35 = vadd.xlane.f32.xlu1 %v34_v8  ;;  %v46_v13 = vsel %vm33_vm0, %v296_v10, 0.0  ;;  %v49_v14 = vsel %vm33_vm0, %v297_v12, 0.0 }
   0x7   :  { %324 = vmatpush3.bf16.msra.mxu1 %v328_v47  ;;  %308 = vmatpush3.bf16.msra.mxu0 %v328_v47 }
   0x9   :  { %44 = vadd.xlane.f32.xlu0 %v43_v9  ;;  %38 = vadd.xlane.f32.xlu1 %v37_v11 }
   0xd   :  { %47 = vadd.xlane.f32.xlu0 %v46_v13  ;;  %50 = vadd.xlane.f32.xlu1 %v49_v14 }
  0x8e   :  { %v42_v15 = vpop.xlane.xlu0 %41  ;;  %v36_v16 = vpop.xlane.xlu1 %35 }
  0x8f   :  { %v55_v17 = vmul.f32 0.03125, %v42_v15  ;;  %v53_v18 = vmul.f32 0.03125, %v36_v16 }
  0x91   :  { %v388_v19 = vsub.f32 %v292_v2, %v55_v17  ;;  %v390_v20 = vsub.f32 %v288_v4, %v53_v18  ;;  %v266_v4 = vld [vmem:[%s478_s1] ss:$0 sm:$0xff] }
  0x92   :  { %v45_v21 = vpop.xlane.xlu0 %44  ;;  %v39_v22 = vpop.xlane.xlu1 %38 }
  0x93   :  { %v56_v23 = vmul.f32 0.03125, %v45_v21  ;;  %v67_v24 = vmul.f32 %v388_v19, %v388_v19  ;;  %v54_v25 = vmul.f32 0.03125, %v39_v22  ;;  %v65_v26 = vmul.f32 %v390_v20, %v390_v20 }
  0x95   :  { %v396_v27 = vsub.f32 %v293_v3, %v56_v23  ;;  %v77_v28 = vsel %vm33_vm0, %v67_v24, 0.0  ;;  %v399_v29 = vsub.f32 %v289_v6, %v54_v25  ;;  %v71_v31 = vsel %vm33_vm0, %v65_v26, 0.0 }
  0x96   :  { %78 = vadd.xlane.f32.xlu0 %v77_v28  ;;  %v48_v30 = vpop.xlane.xlu0 %47  ;;  %v51_v32 = vpop.xlane.xlu1 %50 }
  0x97   :  { %v57_v33 = vmul.f32 0.03125, %v48_v30  ;;  %v68_v34 = vmul.f32 %v396_v27, %v396_v27  ;;  %v58_v35 = vmul.f32 0.03125, %v51_v32  ;;  %v66_v36 = vmul.f32 %v399_v29, %v399_v29 }
  0x99   :  { %v406_v37 = vsub.f32 %v296_v10, %v57_v33  ;;  %v80_v38 = vsel %vm33_vm0, %v68_v34, 0.0  ;;  %v409_v39 = vsub.f32 %v297_v12, %v58_v35  ;;  %v74_v41 = vsel %vm33_vm0, %v66_v36, 0.0  ;;  %v267_v10 = vld [vmem:[%s479_s2] ss:$0 sm:$0xff] }
  0x9a   :  { %81 = vadd.xlane.f32.xlu1 %v80_v38  ;;  %72 = vadd.xlane.f32.xlu0 %v71_v31  ;;  %v268_v31 = vld [vmem:[%s480_s4] ss:$0 sm:$0xff] }
  0x9b   :  { %v69_v40 = vmul.f32 %v406_v37, %v406_v37  ;;  %v70_v42 = vmul.f32 %v409_v39, %v409_v39 }
  0x9d   :  { %v83_v43 = vsel %vm33_vm0, %v69_v40, 0.0  ;;  %v86_v44 = vsel %vm33_vm0, %v70_v42, 0.0 }
  0x9e   :  { %84 = vadd.xlane.f32.xlu0 %v83_v43  ;;  %75 = vadd.xlane.f32.xlu1 %v74_v41 }
  0xa2   :  { %87 = vadd.xlane.f32.xlu1 %v86_v44 }
 0x11f   :  { %v79_v48 = vpop.xlane.xlu0 %78 }
 0x120   :  { %v91_v49 = vmul.f32 0.03125, %v79_v48 }
 0x122   :  { %v97_v50 = vadd.f32 1e-06, %v91_v49 }
 0x123   :  { %v73_v51 = vpop.xlane.xlu0 %72  ;;  %v82_v52 = vpop.xlane.xlu1 %81 }
 0x124   :  { %329 = vrsqrt.f32 %v97_v50  ;;  %v89_v53 = vmul.f32 0.03125, %v73_v51  ;;  %v92_v54 = vmul.f32 0.03125, %v82_v52 }
 0x126   :  { %v95_v55 = vadd.f32 1e-06, %v89_v53  ;;  %v98_v56 = vadd.f32 1e-06, %v92_v54 }
 0x127   :  { %v85_v57 = vpop.xlane.xlu0 %84  ;;  %v76_v58 = vpop.xlane.xlu1 %75 }
 0x128   :  { %331 = vrsqrt.f32 %v95_v55  ;;  %v93_v59 = vmul.f32 0.03125, %v85_v57  ;;  %v90_v60 = vmul.f32 0.03125, %v76_v58 }
 0x129   :  { %333 = vrsqrt.f32 %v98_v56 }
 0x12a   :  { %v99_v61 = vadd.f32 1e-06, %v93_v59  ;;  %v96_v62 = vadd.f32 1e-06, %v90_v60 }
 0x12b   :  { %v88_v63 = vpop.xlane.xlu1 %87 }
 0x12c   :  { %335 = vrsqrt.f32 %v99_v61  ;;  %v94_v0 = vmul.f32 0.03125, %v88_v63 }
 0x12d   :  { %337 = vrsqrt.f32 %v96_v62 }
 0x12e   :  { %v100_v1 = vadd.f32 1e-06, %v94_v0 }
 0x130   :  { %339 = vrsqrt.f32 %v100_v1 }
 0x131   :  { %v330_v2 = vpop.eup %329 }
 0x132   :  { %v109_v3 = vmul.f32 %v330_v2, %v388_v19 }
 0x134   :  { %v122_v8 = vmul.f32 %v266_v4, %v109_v3 }
 0x135   :  { %v332_v5 = vpop.eup %331 }
 0x136   :  { %v334_v6 = vpop.eup %333  ;;  %v107_v9 = vmul.f32 %v332_v5, %v390_v20  ;;  %v135_v15 = vadd.f32 %v267_v10, %v122_v8 }
 0x137   :  { %v110_v7 = vmul.f32 %v334_v6, %v396_v27 }
 0x138   :  { %v120_v18 = vmul.f32 %v266_v4, %v107_v9 }
 0x139   :  { %v336_v11 = vpop.eup %335  ;;  %v123_v12 = vmul.f32 %v266_v4, %v110_v7 }
 0x13a   :  { %v338_v13 = vpop.eup %337  ;;  %v111_v14 = vmul.f32 %v336_v11, %v406_v37  ;;  %v133_v24 = vadd.f32 %v267_v10, %v120_v18 }
 0x13b   :  { %v136_v16 = vadd.f32 %v267_v10, %v123_v12  ;;  %v108_v17 = vmul.f32 %v338_v13, %v399_v29 }
 0x13c   :  { %v124_v20 = vmul.f32 %v266_v4, %v111_v14 }
 0x13d   :  { %v340_v19 = vpop.eup %339  ;;  %v140_v21 = vpack.c.bf16 %v136_v16, %v135_v15  ;;  %v121_v22 = vmul.f32 %v266_v4, %v108_v17 }
 0x13e   :  { %v112_v23 = vmul.f32 %v340_v19, %v409_v39  ;;  %v137_v28 = vadd.f32 %v267_v10, %v124_v20 }
 0x13f   :  { %314 = vmatmul.mubr.msk.bf16.vlgmr.msra.gmra.mxu1 %vm33_vm0, %v140_v21  ;;  %v134_v25 = vadd.f32 %v267_v10, %v121_v22 }
 0x140   :  { %317 = vmatprep.mubr.msk.bf16.mxu1 %vm342_vm1, %v341_v45  ;;  %v125_v26 = vmul.f32 %v266_v4, %v112_v23 }
 0x141   :  { %v139_v27 = vpack.c.bf16 %v134_v25, %v133_v24 }
 0x142   :  { %v138_v30 = vadd.f32 %v267_v10, %v125_v26 }
 0x143   :  { %310 = vmatmul.mubr.msk.bf16.vlgmr.msra.gmra.mxu0 %vm33_vm0, %v139_v27 }
 0x144   :  { %v141_v29 = vpack.c.bf16 %v138_v30, %v137_v28 }
 0x147   :  { %318 = vmatmul.mubr.msk.bf16.gmra.mxu1 %vm33_vm0, %v141_v29 }
 0x1ff   :  { %v216_v32 = vpop.f32.mrf.mxu1 }
 0x200   :  { %v217_v33 = vadd.f32 %v268_v31, %v216_v32 }
 0x201   :  { %v315_v34 = vpop.f32.mrf.mxu1 }
 0x202   :  { %v282_v35 = vpack.c.bf16 %v217_v33, %v217_v33 }
 0x203   :  { %v208_v36 = vpop.f32.mrf.mxu0  ;;  %v219_v37 = vpop.f32.mrf.mxu1 }
 0x204   :  { %258 = vst.msk [vmem:[%s481_s5 + $0x8] sm:$0xf] %vm255_vm2, %v282_v35  ;;  %v209_v38 = vadd.f32 %v268_v31, %v208_v36  ;;  %v220_v39 = vadd.f32 %v268_v31, %v219_v37 }
 0x205   :  { %v311_v40 = vpop.f32.mrf.mxu0  ;;  %v316_v41 = vpop.f32.mrf.mxu1 }
 0x206   :  { %v280_v42 = vpack.c.bf16 %v209_v38, %v209_v38  ;;  %v283_v43 = vpack.c.bf16 %v220_v39, %v220_v39 }
 0x207   :  { %v211_v44 = vpop.f32.mrf.mxu0  ;;  %v224_v45 = vpop.f32.mrf.mxu1 }
 0x208   :  { %256 = vst.msk [vmem:[%s481_s5] sm:$0xf] %vm255_vm2, %v280_v42  ;;  %259 = vst.msk [vmem:[%s481_s5 + $0xc] sm:$0xf] %vm255_vm2, %v283_v43  ;;  %v212_v46 = vadd.f32 %v268_v31, %v211_v44  ;;  %v225_v47 = vadd.f32 %v268_v31, %v224_v45 }
 0x209   :  { %v312_v48 = vpop.f32.mrf.mxu0  ;;  %v319_v49 = vpop.f32.mrf.mxu1 }
 0x20a   :  { %v281_v50 = vpack.c.bf16 %v212_v46, %v212_v46  ;;  %v284_v51 = vpack.c.bf16 %v225_v47, %v225_v47 }
 0x20b   :  { %v227_v52 = vpop.f32.mrf.mxu1 }
 0x20c   :  { %257 = vst.msk [vmem:[%s481_s5 + $0x4] sm:$0xf] %vm255_vm2, %v281_v50  ;;  %260 = vst.msk [vmem:[%s481_s5 + $0x10] sm:$0xf] %vm255_vm2, %v284_v51  ;;  %v228_v53 = vadd.f32 %v268_v31, %v227_v52 }
 0x20d   :  { %v320_v54 = vpop.f32.mrf.mxu1 }
 0x20e   :  { %v285_v55 = vpack.c.bf16 %v228_v53, %v228_v53 }
 0x210   :  { %261 = vst.msk [vmem:[%s481_s5 + $0x14] sm:$0xf] %vm255_vm2, %v285_v55 }

// kernel: build_transformer_forward.12
= control target key start
LH: loop header
LB: loop body
LE: loop exit
PB: predicated region body
PF: predicated region fallthrough
CT: control target
= control target key end

     0   :  { %vm19_vm0 = vcmask 261120   ;;  %v211_v1 = vmov 0.0   ;;  %vm66_vm1 = vcmask 392192   ;;  %vm165_vm2 = vcmask 257024   ;;  %s270_s1 = inlined_call_operand.vmem [shape: bf16[48,32], index: 1, kind: input, shape index: {}]   ;;  %s271_s0 = inlined_call_operand.vmem [shape: bf16[32,48], index: 0, kind: input, shape index: {}]   ;;  %s272_s2 = inlined_call_operand.vmem [shape: f32[1,32], index: 2, kind: input, shape index: {}]   ;;  %s273_s3 = inlined_call_operand.vmem [shape: bf16[32,32], index: 3, kind: output, shape index: {}]  }
   0x1   :  { %v206_v0 = vld [vmem:[%s270_s1 + $0x10] sm:$0xff]   ;;  %22 = vst.msk [vmem:[#allocation2 + $0x10] sm:$0xff] %vm19_vm0, %v211_v1  ;;  %20 = vst.msk [vmem:[#allocation2] sm:$0xff] %vm19_vm0, %v211_v1  ;;  %v207_v2 = vld [vmem:[%s270_s1 + $0x8] sm:$0xff]  }
   0x2   :  { %21 = vst.msk [vmem:[#allocation2 + $0x8] sm:$0xff] %vm19_vm0, %v211_v1  ;;  %23 = vst.msk [vmem:[#allocation2 + $0x18] sm:$0xff] %vm19_vm0, %v211_v1  ;;  %195 = vmatprep.subr.bf16.mxu0 %v206_v0  ;;  %v209_v3 = vld [vmem:[%s271_s0] sm:$0xff]   ;;  %v210_v5 = vld [vmem:[%s271_s0 + $0x8] sm:$0xff]  }
   0x3   :  { %196 = vmatpush3.bf16.msra.mxu0 %v206_v0  ;;  %v208_v4 = vld [vmem:[%s270_s1] sm:$0xff]   ;;  %201 = vmatprep.mubr.msk.bf16.mxu0 %vm66_vm1, %v209_v3 }
   0x4   :  { %197 = vmatprep.subr.bf16.mxu0 %v207_v2  ;;  %v181_v18 = vld [vmem:[%s272_s2] ss:$0 sm:$0xff] }
   0x7   :  { %198 = vmatpush3.bf16.msra.mxu0 %v207_v2 }
   0x8   :  { %199 = vmatprep.subr.bf16.mxu0 %v208_v4  ;;  %v26_v6 = vld [vmem:[#allocation2 + $0x10] sm:$0xff]  ;;  %v24_v8 = vld [vmem:[#allocation2] sm:$0xff] }
   0x9   :  { %v27_v11 = vld [vmem:[#allocation2 + $0x18] sm:$0xff]  ;;  %v25_v14 = vld [vmem:[#allocation2 + $0x8] sm:$0xff] }
   0xb   :  { %200 = vmatpush3.bf16.msra.mxu0 %v208_v4 }
   0xe   :  { %202 = vmatmul.mubr.msk.bf16.vlgmr.msra.gmra.mxu0 %vm66_vm1, %v210_v5 }
  0xce   :  { %v203_v7 = vpop.f32.mrf.mxu0 }
  0xcf   :  { %v124_v9 = vadd.f32 %v203_v7, %v26_v6 }
  0xd0   :  { %v107_v10 = vpop.f32.mrf.mxu0 }
  0xd1   :  { %129 = vst.msk [vmem:[#allocation2 + $0x10] sm:$0xff] %vm19_vm0, %v124_v9  ;;  %v122_v12 = vadd.f32 %v107_v10, %v24_v8 }
  0xd2   :  { %v204_v13 = vpop.f32.mrf.mxu0 }
  0xd3   :  { %127 = vst.msk [vmem:[#allocation2] sm:$0xff] %vm19_vm0, %v122_v12  ;;  %v125_v15 = vadd.f32 %v204_v13, %v27_v11 }
  0xd4   :  { %v110_v16 = vpop.f32.mrf.mxu0 }
  0xd5   :  { %130 = vst.msk [vmem:[#allocation2 + $0x18] sm:$0xff] %vm19_vm0, %v125_v15  ;;  %v123_v17 = vadd.f32 %v110_v16, %v25_v14 }
  0xd7   :  { %128 = vst.msk [vmem:[#allocation2 + $0x8] sm:$0xff] %vm19_vm0, %v123_v17 }
  0xd8   :  { %v136_v19 = vld [vmem:[#allocation2 + $0x10] sm:$0xff] }
  0xd9   :  { %v147_v20 = vadd.f32 %v181_v18, %v136_v19 }
  0xda   :  { %v134_v21 = vld [vmem:[#allocation2] sm:$0xff] }
  0xdb   :  { %v188_v22 = vpack.c.bf16 %v147_v20, %v147_v20  ;;  %v145_v23 = vadd.f32 %v181_v18, %v134_v21 }
  0xdc   :  { %v137_v24 = vld [vmem:[#allocation2 + $0x18] sm:$0xff] }
  0xdd   :  { %168 = vst.msk [vmem:[%s273_s3 + $0x8] sm:$0xf] %vm165_vm2, %v188_v22  ;;  %v186_v25 = vpack.c.bf16 %v145_v23, %v145_v23  ;;  %v148_v26 = vadd.f32 %v181_v18, %v137_v24 }
  0xde   :  { %v135_v27 = vld [vmem:[#allocation2 + $0x8] sm:$0xff] }
  0xdf   :  { %166 = vst.msk [vmem:[%s273_s3] sm:$0xf] %vm165_vm2, %v186_v25  ;;  %v189_v28 = vpack.c.bf16 %v148_v26, %v148_v26  ;;  %v146_v29 = vadd.f32 %v181_v18, %v135_v27 }
  0xe1   :  { %169 = vst.msk [vmem:[%s273_s3 + $0xc] sm:$0xf] %vm165_vm2, %v189_v28  ;;  %v187_v30 = vpack.c.bf16 %v146_v29, %v146_v29 }
  0xe3   :  { %167 = vst.msk [vmem:[%s273_s3 + $0x4] sm:$0xf] %vm165_vm2, %v187_v30 }

// kernel: build_transformer_forward.14
= control target key start
LH: loop header
LB: loop body
LE: loop exit
PB: predicated region body
PF: predicated region fallthrough
CT: control target
= control target key end

     0   :  { %s1184_s6 = smov 0   ;;  %s1357_s0 = inlined_call_operand.vmem [shape: bf16[2,24,96], index: 0, kind: input, shape index: {}]   ;;  %s1358_s1 = inlined_call_operand.vmem [shape: bf16[2,24,32], index: 1, kind: output, shape index: {}]  }
   0x1 LB: > { %s920_s7 = sadd.s32 4294967295, %s1157_s6   ;;  %p924_p0 = scmp.ge.s32.totalorder %s1157_s6, 1  ;;  %s1157_s6 = sphi %s1184_s6, %s11_s6  }
   0x2   : > { %p87_p1 = scmp.lt.s32.totalorder %s1157_s6, 3 }
   0x4   : > { %p88_p2 = pnand %p924_p0, %p87_p1 }
   0x5   : > { %p107_p3 = scmp.lt.s32.totalorder (!%p88_p2), %s920_s7, 1  ;;  %s1159_s12 = smov (!%p88_p2), 96  }
   0x6   : > { %91 = sbr.rel (%p88_p2) target bundleno = 2600 (0xa28), region = 24  ;;  %s1161_s13 = smov (!%p88_p2), 64  }
   0x7   : > { %s1162_s14 = smov (!%p88_p2), 88   ;;  %s1163_s15 = smov (!%p88_p2), 120  }
   0x8   : > { %s1164_s16 = smov (!%p88_p2), 56   ;;  %s1165_s17 = smov (!%p88_p2), 80  }
   0x9   : > { %s1166_s18 = smov (!%p88_p2), 112   ;;  %s1167_s19 = smov (!%p88_p2), 48  }
   0xa   : > { %s1168_s20 = smov (!%p88_p2), 72   ;;  %s1169_s21 = smov (!%p88_p2), 104  }
   0xb   : > { %s1360_s7 = smov (!%p107_p3, %s920_s7), 1  ;;  %vm145_vm0 = vcmask 64512   ;;  %v129_v15 = vlaneseq  ;;  %v1160_v17 = vmov -1e+30   ;;  %vm206_vm2 = vcmask 195584   ;;  %s1170_s22 = smov 40  }
   0xc   : > { %s1061_s8 = smul.u32 12, %s1360_s7  ;;  %vm253_vm3 = vcmask 1043456   ;;  %s1171_s23 = smov 8   ;;  %vm841_vm4 = vcmask 130048   ;;  %vm861_vm5 = vcmask 257024  }
   0xd   : > { %v130_v16 = vand.u32 127, %v129_v15  ;;  %s1172_s24 = smov 16   ;;  %s1173_s25 = smov 24  }
   0xe   : > { %s111_s11 = scalar_lea.vmem %s1357_s0, %s1061_s8  ;;  %s116_s28 = scalar_lea.vmem %s1358_s1, %s1061_s8 }
   0xf   : > { %v120_v0 = vld [vmem:[%s111_s11 + $0x8] sm:$0xf]  ;;  %v1200_v1 = vld [vmem:[%s111_s11] sm:$0xff]   ;;  %vm131_vm1 = vcmp.lt.s32.totalorder %v130_v16, 17 }
  0x10   : > { %v1202_v2 = vcombine.low %v120_v0, %v120_v0  ;;  %v121_v3 = vunpack.c.l.bf16 %v1200_v1  ;;  %v122_v4 = vunpack.c.h.bf16 %v1200_v1  ;;  %v123_v11 = vunpack.c.l.bf16 %v120_v0 }
  0x11   : > { %v1220_v18 = vsel %vm131_vm1, 0.0, %v1160_v17 }
  0x12   : > { %143 = vrot.lane.b32.xlu0 %v1202_v2, %s1159_s12  ;;  %v124_v5 = vmul.f32 0.35355338, %v121_v3  ;;  %v125_v6 = vmul.f32 0.35355338, %v122_v4  ;;  %v126_v13 = vmul.f32 0.35355338, %v123_v11 }
  0x14   : > { %v1207_v7 = vpack.c.bf16 %v125_v6, %v124_v5  ;;  %v1216_v14 = vpack.c.bf16 %v126_v13, %v126_v13 }
  0x16   : > { %141 = vrot.lane.b32.xlu0 %v1200_v1, %s1159_s12  ;;  %989 = vmatprep.mubr.msk.bf16.mxu0 %vm145_vm0, %v1207_v7 }
  0x84   : > { %v144_v8 = vpop.permute.xlu0 %143 }
  0x85   : > { %1049 = vmatprep.subr.msk.bf16.mxu0 %vm145_vm0, %v144_v8  ;;  %v156_v9 = vsel %vm145_vm0, %v144_v8, 0 }
  0x86   : > { %986 = vmatpush3.bf16.xpose.msra.mxu0 %v156_v9 }
  0x88   : > { %v142_v10 = vpop.permute.xlu0 %141 }
  0x89   : > { %1050 = vmatprep.subr.msk.bf16.mxu0 %vm145_vm0, %v142_v10  ;;  %v153_v12 = vsel %vm145_vm0, %v142_v10, 0 }
  0x8e   : > { %988 = vmatpush3.bf16.xpose.msra.mxu0 %v153_v12 }
  0x95   : > { %990 = vmatmul.mubr.msk.bf16.vlgmr.msra.gmra.mxu0 %vm145_vm0, %v1216_v14 }
 0x155   : > { %v991_v19 = vpop.f32.mrf.mxu0 }
 0x156   : > { %v201_v20 = vadd.f32 %v991_v19, %v1220_v18 }
 0x157   : > { %v192_v21 = vpop.f32.mrf.mxu0 }
 0x158   : > { %v193_v22 = vadd.f32 %v192_v21, %v1220_v18  ;;  %v213_v23 = vsel %vm206_vm2, %v201_v20, -inf }
 0x159   : > { %214 = vmax.xlane.f32.xlu0 %v213_v23  ;;  %v992_v24 = vpop.f32.mrf.mxu0 }
 0x15a   : > { %v207_v25 = vsel %vm206_vm2, %v193_v22, -inf }
 0x15b   : > { %v195_v26 = vpop.f32.mrf.mxu0  ;;  %208 = vmax.xlane.f32.xlu1 %v207_v25 }
 0x15c   : > { %v196_v27 = vadd.f32 %v195_v26, %v1220_v18 }
 0x15e   : > { %v210_v28 = vsel %vm206_vm2, %v196_v27, -inf }
 0x15f   : > { %211 = vmax.xlane.f32.xlu1 %v210_v28 }
 0x16f   : > { %313 = vrot.lane.b32.xlu0 %v1202_v2, %s1162_s14 }
 0x170   : > { %244 = vrot.lane.b32.xlu1 %v1202_v2, %s1161_s13 }
 0x1e2   : > { %v215_v29 = vpop.xlane.xlu0 %214 }
 0x1e3   : > { %v218_v30 = vsub.f32 %v201_v20, %v215_v29 }
 0x1e4   : > { %v209_v31 = vpop.xlane.xlu1 %208 }
 0x1e5   : > { %v223_v32 = vmul.f32 1.442695, %v218_v30  ;;  %v216_v33 = vsub.f32 %v193_v22, %v209_v31 }
 0x1e6   : > { %v314_v50 = vpop.permute.xlu0 %313 }
 0x1e7   : > { %1103 = vpow2.f32 %v223_v32  ;;  %v219_v34 = vmul.f32 1.442695, %v216_v33  ;;  %v325_v59 = vsel %vm145_vm0, %v314_v50, 0 }
 0x1e8   : > { %v212_v35 = vpop.xlane.xlu1 %211 }
 0x1e9   : > { %1105 = vpow2.f32 %v219_v34  ;;  %v217_v36 = vsub.f32 %v196_v27, %v212_v35 }
 0x1eb   : > { %v221_v37 = vmul.f32 1.442695, %v217_v36 }
 0x1ec   : > { %v245_v38 = vpop.permute.xlu1 %244 }
 0x1ed   : > { %1107 = vpow2.f32 %v221_v37  ;;  %1051 = vmatprep.subr.msk.bf16.mxu1 %vm253_vm3, %v245_v38  ;;  %v255_v39 = vsel %vm253_vm3, %v245_v38, 0 }
 0x1ee   : > { %994 = vmatpush3.bf16.msra.mxu1 %v255_v39 }
 0x1f4   : > { %v1104_v40 = vpop.eup %1103 }
 0x1f5   : > { %v231_v41 = vsel %vm206_vm2, %v1104_v40, 0.0 }
 0x1f6   : > { %v1106_v42 = vpop.eup %1105  ;;  %232 = vadd.xlane.f32.xlu1 %v231_v41 }
 0x1f7   : > { %v225_v43 = vsel %vm206_vm2, %v1106_v42, 0.0 }
 0x1fa   : > { %v1108_v44 = vpop.eup %1107  ;;  %226 = vadd.xlane.f32.xlu1 %v225_v43 }
 0x1fb   : > { %v228_v45 = vsel %vm206_vm2, %v1108_v44, 0.0 }
 0x1fe   : > { %229 = vadd.xlane.f32.xlu1 %v228_v45 }
 0x20f   : > { %242 = vrot.lane.b32.xlu1 %v1200_v1, %s1161_s13 }
 0x213   : > { %311 = vrot.lane.b32.xlu1 %v1200_v1, %s1162_s14 }
 0x217   : > { %307 = vrot.lane.b32.xlu1 %v1207_v7, %s1163_s15 }
 0x21b   : > { %309 = vrot.lane.b32.xlu1 %v1216_v14, %s1163_s15 }
 0x27f   : > { %v233_v46 = vpop.xlane.xlu1 %232 }
 0x280   : > { %1109 = vrcp.f32 %v233_v46 }
 0x283   : > { %v227_v47 = vpop.xlane.xlu1 %226 }
 0x284   : > { %1111 = vrcp.f32 %v227_v47 }
 0x287   : > { %v230_v48 = vpop.xlane.xlu1 %229 }
 0x288   : > { %1113 = vrcp.f32 %v230_v48 }
 0x28b   : > { %v243_v49 = vpop.permute.xlu1 %242 }
 0x28c   : > { %995 = vmatprep.subr.bf16.mxu1 %v243_v49 }
 0x28d   : > { %996 = vmatpush3.bf16.msra.mxu1 %v243_v49  ;;  %v1110_v51 = vpop.eup %1109 }
 0x28e   : > { %1052 = vmatprep.subr.msk.bf16.mxu1 %vm145_vm0, %v314_v50  ;;  %v239_v55 = vmul.f32 %v1110_v51, %v1104_v40 }
 0x28f   : > { %v312_v53 = vpop.permute.xlu1 %311 }
 0x290   : > { %v241_v60 = vpack.c.bf16 %v239_v55, %v239_v55  ;;  %v322_v62 = vsel %vm145_vm0, %v312_v53, 0 }
 0x291   : > { %v1112_v52 = vpop.eup %1111 }
 0x292   : > { %v237_v56 = vmul.f32 %v1112_v52, %v1106_v42 }
 0x293   : > { %v308_v61 = vpop.permute.xlu1 %307 }
 0x295   : > { %v1114_v54 = vpop.eup %1113 }
 0x296   : > { %v238_v57 = vmul.f32 %v1114_v54, %v1108_v44 }
 0x297   : > { %v310_v63 = vpop.permute.xlu1 %309 }
 0x298   : > { %v240_v58 = vpack.c.bf16 %v238_v57, %v237_v56 }
 0x29a   : > { %997 = vmatprep.mubr.msk.bf16.mxu1 %vm206_vm2, %v240_v58 }
 0x29b   : > { %998 = vmatmul.mubr.msk.bf16.vlgmr.msra.gmra.mxu1 %vm206_vm2, %v241_v60 }
 0x29c   : > { %1002 = vmatpush3.bf16.xpose.msra.mxu1 %v325_v59  ;;  %1005 = vmatprep.mubr.msk.bf16.mxu1 %vm145_vm0, %v308_v61 }
 0x29d   : > { %1053 = vmatprep.subr.msk.bf16.mxu1 %vm145_vm0, %v312_v53 }
 0x2a4   : > { %1004 = vmatpush3.bf16.xpose.msra.mxu1 %v322_v62 }
 0x2ab   : > { %1006 = vmatmul.mubr.msk.bf16.vlgmr.msra.gmra.mxu1 %vm145_vm0, %v310_v63 }
 0x35b   : > { %v1247_v0 = vpop.f32.mrf.mxu1 }
 0x35d   : > { %v1249_v3 = vpop.f32.mrf.mxu1 }
 0x35f   : > { %v1000_v4 = vpop.f32.mrf.mxu1 }
 0x361   : > { %v1251_v5 = vpop.f32.mrf.mxu1 }
 0x36b   : > { %v1007_v6 = vpop.f32.mrf.mxu1 }
 0x36c   : > { %v370_v11 = vadd.f32 %v1007_v6, %v1220_v18 }
 0x36d   : > { %v361_v8 = vpop.f32.mrf.mxu1 }
 0x36e   : > { %v362_v9 = vadd.f32 %v361_v8, %v1220_v18  ;;  %v381_v17 = vsel %vm206_vm2, %v370_v11, -inf }
 0x36f   : > { %v1008_v10 = vpop.f32.mrf.mxu1 }
 0x370   : > { %v375_v12 = vsel %vm206_vm2, %v362_v9, -inf }
 0x371   : > { %v364_v13 = vpop.f32.mrf.mxu1  ;;  %376 = vmax.xlane.f32.xlu1 %v375_v12 }
 0x372   : > { %v365_v15 = vadd.f32 %v364_v13, %v1220_v18 }
 0x374   : > { %v378_v16 = vsel %vm206_vm2, %v365_v15, -inf }
 0x375   : > { %379 = vmax.xlane.f32.xlu0 %v378_v16  ;;  %382 = vmax.xlane.f32.xlu1 %v381_v17 }
 0x386   : > { %412 = vrot.lane.b32.xlu1 %v1202_v2, %s1164_s16 }
 0x3fa   : > { %v377_v19 = vpop.xlane.xlu1 %376 }
 0x3fb   : > { %v384_v20 = vsub.f32 %v362_v9, %v377_v19 }
 0x3fd   : > { %v387_v27 = vmul.f32 1.442695, %v384_v20 }
 0x3fe   : > { %v380_v21 = vpop.xlane.xlu0 %379  ;;  %v383_v22 = vpop.xlane.xlu1 %382 }
 0x3ff   : > { %v385_v23 = vsub.f32 %v365_v15, %v380_v21  ;;  %v386_v24 = vsub.f32 %v370_v11, %v383_v22 }
 0x401   : > { %v389_v25 = vmul.f32 1.442695, %v385_v23  ;;  %v391_v26 = vmul.f32 1.442695, %v386_v24 }
 0x402   : > { %v413_v28 = vpop.permute.xlu1 %412 }
 0x403   : > { %1115 = vpow2.f32 %v389_v25  ;;  %v422_v29 = vsel %vm253_vm3, %v413_v28, 0  ;;  %1054 = vmatprep.subr.msk.bf16.mxu0 %vm253_vm3, %v413_v28 }
 0x404   : > { %1117 = vpow2.f32 %v391_v26  ;;  %1010 = vmatpush3.bf16.msra.mxu0 %v422_v29 }
 0x405   : > { %1119 = vpow2.f32 %v387_v27 }
 0x410   : > { %v1116_v30 = vpop.eup %1115 }
 0x411   : > { %v1118_v31 = vpop.eup %1117  ;;  %v396_v32 = vsel %vm206_vm2, %v1116_v30, 0.0 }
 0x412   : > { %397 = vadd.xlane.f32.xlu1 %v396_v32  ;;  %v399_v33 = vsel %vm206_vm2, %v1118_v31, 0.0  ;;  %v1120_v34 = vpop.eup %1119 }
 0x413   : > { %400 = vadd.xlane.f32.xlu0 %v399_v33  ;;  %v393_v35 = vsel %vm206_vm2, %v1120_v34, 0.0 }
 0x417   : > { %394 = vadd.xlane.f32.xlu0 %v393_v35 }
 0x423   : > { %478 = vrot.lane.b32.xlu1 %v1202_v2, %s1165_s17 }
 0x427   : > { %476 = vrot.lane.b32.xlu1 %v1200_v1, %s1165_s17 }
 0x42b   : > { %474 = vrot.lane.b32.xlu1 %v1216_v14, %s1166_s18 }
 0x42d   : > { %410 = vrot.lane.b32.xlu0 %v1200_v1, %s1164_s16 }
 0x431   : > { %472 = vrot.lane.b32.xlu0 %v1207_v7, %s1166_s18 }
 0x49b   : > { %v398_v37 = vpop.xlane.xlu1 %397 }
 0x49c   : > { %v401_v36 = vpop.xlane.xlu0 %400 }
 0x49d   : > { %1121 = vrcp.f32 %v401_v36 }
 0x49e   : > { %1123 = vrcp.f32 %v398_v37 }
 0x49f   : > { %v479_v40 = vpop.permute.xlu1 %478 }
 0x4a0   : > { %v395_v38 = vpop.xlane.xlu0 %394  ;;  %v490_v48 = vsel %vm145_vm0, %v479_v40, 0 }
 0x4a1   : > { %1125 = vrcp.f32 %v395_v38 }
 0x4a3   : > { %v477_v51 = vpop.permute.xlu1 %476 }
 0x4a4   : > { %v411_v39 = vpop.permute.xlu0 %410  ;;  %v487_v52 = vsel %vm145_vm0, %v477_v51, 0 }
 0x4a5   : > { %1011 = vmatprep.subr.bf16.mxu0 %v411_v39 }
 0x4a6   : > { %1012 = vmatpush3.bf16.msra.mxu0 %v411_v39 }
 0x4a7   : > { %1055 = vmatprep.subr.msk.bf16.mxu0 %vm145_vm0, %v479_v40  ;;  %v475_v53 = vpop.permute.xlu1 %474 }
 0x4a8   : > { %v473_v50 = vpop.permute.xlu0 %472 }
 0x4aa   : > { %v1122_v41 = vpop.eup %1121 }
 0x4ab   : > { %v1124_v42 = vpop.eup %1123  ;;  %v407_v44 = vmul.f32 %v1122_v41, %v1118_v31 }
 0x4ac   : > { %v406_v46 = vmul.f32 %v1124_v42, %v1116_v30 }
 0x4ad   : > { %v409_v49 = vpack.c.bf16 %v407_v44, %v407_v44 }
 0x4ae   : > { %v1126_v43 = vpop.eup %1125 }
 0x4af   : > { %v405_v45 = vmul.f32 %v1126_v43, %v1120_v34 }
 0x4b1   : > { %v408_v47 = vpack.c.bf16 %v406_v46, %v405_v45 }
 0x4b3   : > { %1013 = vmatprep.mubr.msk.bf16.mxu0 %vm206_vm2, %v408_v47 }
 0x4b4   : > { %1014 = vmatmul.mubr.msk.bf16.vlgmr.msra.gmra.mxu0 %vm206_vm2, %v409_v49 }
 0x4b5   : > { %1018 = vmatpush3.bf16.xpose.msra.mxu0 %v490_v48  ;;  %1021 = vmatprep.mubr.msk.bf16.mxu0 %vm145_vm0, %v473_v50 }
 0x4b6   : > { %1056 = vmatprep.subr.msk.bf16.mxu0 %vm145_vm0, %v477_v51 }
 0x4bd   : > { %1020 = vmatpush3.bf16.xpose.msra.mxu0 %v487_v52 }
 0x4c4   : > { %1022 = vmatmul.mubr.msk.bf16.vlgmr.msra.gmra.mxu0 %vm145_vm0, %v475_v53 }
 0x574   : > { %v1280_v54 = vpop.f32.mrf.mxu0 }
 0x576   : > { %v1282_v55 = vpop.f32.mrf.mxu0 }
 0x578   : > { %v1016_v56 = vpop.f32.mrf.mxu0 }
 0x57a   : > { %v1284_v57 = vpop.f32.mrf.mxu0 }
 0x57b   : > { %v1085_v58 = vpack.i.bf16 %v1284_v57, %v1282_v55 }
 0x584   : > { %v1023_v59 = vpop.f32.mrf.mxu0 }
 0x585   : > { %v535_v63 = vadd.f32 %v1023_v59, %v1220_v18 }
 0x586   : > { %v526_v60 = vpop.f32.mrf.mxu0 }
 0x587   : > { %v527_v61 = vadd.f32 %v526_v60, %v1220_v18  ;;  %v546_v10 = vsel %vm206_vm2, %v535_v63, -inf }
 0x588   : > { %v1024_v62 = vpop.f32.mrf.mxu0 }
 0x589   : > { %v540_v4 = vsel %vm206_vm2, %v527_v61, -inf }
 0x58a   : > { %v529_v6 = vpop.f32.mrf.mxu0  ;;  %541 = vmax.xlane.f32.xlu0 %v540_v4 }
 0x58b   : > { %v530_v8 = vadd.f32 %v529_v6, %v1220_v18 }
 0x58d   : > { %v543_v9 = vsel %vm206_vm2, %v530_v8, -inf }
 0x58e   : > { %544 = vmax.xlane.f32.xlu1 %v543_v9  ;;  %547 = vmax.xlane.f32.xlu0 %v546_v10 }
 0x59f   : > { %577 = vrot.lane.b32.xlu1 %v1202_v2, %s1167_s19 }
 0x613   : > { %v542_v11 = vpop.xlane.xlu0 %541 }
 0x614   : > { %v549_v12 = vsub.f32 %v527_v61, %v542_v11 }
 0x616   : > { %v552_v21 = vmul.f32 1.442695, %v549_v12 }
 0x617   : > { %v545_v13 = vpop.xlane.xlu1 %544  ;;  %v548_v15 = vpop.xlane.xlu0 %547 }
 0x618   : > { %v550_v16 = vsub.f32 %v530_v8, %v545_v13  ;;  %v551_v17 = vsub.f32 %v535_v63, %v548_v15 }
 0x61a   : > { %v554_v19 = vmul.f32 1.442695, %v550_v16  ;;  %v556_v20 = vmul.f32 1.442695, %v551_v17 }
 0x61b   : > { %v578_v22 = vpop.permute.xlu1 %577 }
 0x61c   : > { %1127 = vpow2.f32 %v554_v19  ;;  %v587_v23 = vsel %vm253_vm3, %v578_v22, 0  ;;  %1057 = vmatprep.subr.msk.bf16.mxu1 %vm253_vm3, %v578_v22 }
 0x61d   : > { %1129 = vpow2.f32 %v556_v20  ;;  %1026 = vmatpush3.bf16.msra.mxu1 %v587_v23 }
 0x61e   : > { %1131 = vpow2.f32 %v552_v21 }
 0x629   : > { %v1128_v24 = vpop.eup %1127 }
 0x62a   : > { %v1130_v25 = vpop.eup %1129  ;;  %v561_v26 = vsel %vm206_vm2, %v1128_v24, 0.0 }
 0x62b   : > { %562 = vadd.xlane.f32.xlu1 %v561_v26  ;;  %v564_v27 = vsel %vm206_vm2, %v1130_v25, 0.0  ;;  %v1132_v28 = vpop.eup %1131 }
 0x62c   : > { %565 = vadd.xlane.f32.xlu0 %v564_v27  ;;  %v558_v29 = vsel %vm206_vm2, %v1132_v28, 0.0 }
 0x630   : > { %559 = vadd.xlane.f32.xlu0 %v558_v29 }
 0x63c   : > { %643 = vrot.lane.b32.xlu1 %v1202_v2, %s1168_s20 }
 0x640   : > { %641 = vrot.lane.b32.xlu1 %v1200_v1, %s1168_s20 }
 0x644   : > { %639 = vrot.lane.b32.xlu1 %v1216_v14, %s1169_s21 }
 0x646   : > { %575 = vrot.lane.b32.xlu0 %v1200_v1, %s1167_s19 }
 0x64a   : > { %637 = vrot.lane.b32.xlu0 %v1207_v7, %s1169_s21 }
 0x6b4   : > { %v563_v30 = vpop.xlane.xlu1 %562 }
 0x6b5   : > { %v566_v31 = vpop.xlane.xlu0 %565 }
 0x6b6   : > { %1133 = vrcp.f32 %v566_v31 }
 0x6b7   : > { %1135 = vrcp.f32 %v563_v30 }
 0x6b8   : > { %v644_v34 = vpop.permute.xlu1 %643 }
 0x6b9   : > { %v560_v32 = vpop.xlane.xlu0 %559  ;;  %v655_v7 = vsel %vm145_vm0, %v644_v34, 0 }
 0x6ba   : > { %1137 = vrcp.f32 %v560_v32 }
 0x6bc   : > { %v642_v43 = vpop.permute.xlu1 %641 }
 0x6bd   : > { %v576_v33 = vpop.permute.xlu0 %575  ;;  %v652_v44 = vsel %vm145_vm0, %v642_v43, 0 }
 0x6be   : > { %1027 = vmatprep.subr.bf16.mxu1 %v576_v33 }
 0x6bf   : > { %1028 = vmatpush3.bf16.msra.mxu1 %v576_v33 }
 0x6c0   : > { %1058 = vmatprep.subr.msk.bf16.mxu1 %vm145_vm0, %v644_v34  ;;  %v640_v45 = vpop.permute.xlu1 %639 }
 0x6c1   : > { %v638_v42 = vpop.permute.xlu0 %637 }
 0x6c3   : > { %v1134_v35 = vpop.eup %1133 }
 0x6c4   : > { %v1136_v36 = vpop.eup %1135  ;;  %v572_v37 = vmul.f32 %v1134_v35, %v1130_v25 }
 0x6c5   : > { %v571_v39 = vmul.f32 %v1136_v36, %v1128_v24 }
 0x6c6   : > { %v574_v41 = vpack.c.bf16 %v572_v37, %v572_v37 }
 0x6c7   : > { %v1138_v14 = vpop.eup %1137 }
 0x6c8   : > { %v570_v38 = vmul.f32 %v1138_v14, %v1132_v28 }
 0x6ca   : > { %v573_v40 = vpack.c.bf16 %v571_v39, %v570_v38 }
 0x6cc   : > { %1029 = vmatprep.mubr.msk.bf16.mxu1 %vm206_vm2, %v573_v40 }
 0x6cd   : > { %1030 = vmatmul.mubr.msk.bf16.vlgmr.msra.gmra.mxu1 %vm206_vm2, %v574_v41 }
 0x6ce   : > { %1034 = vmatpush3.bf16.xpose.msra.mxu1 %v655_v7  ;;  %1037 = vmatprep.mubr.msk.bf16.mxu1 %vm145_vm0, %v638_v42 }
 0x6cf   : > { %1059 = vmatprep.subr.msk.bf16.mxu1 %vm145_vm0, %v642_v43 }
 0x6d6   : > { %1036 = vmatpush3.bf16.xpose.msra.mxu1 %v652_v44 }
 0x6dd   : > { %1038 = vmatmul.mubr.msk.bf16.vlgmr.msra.gmra.mxu1 %vm145_vm0, %v640_v45 }
 0x78d   : > { %v1031_v46 = vpop.f32.mrf.mxu1 }
 0x78f   : > { %v623_v47 = vpop.f32.mrf.mxu1 }
 0x791   : > { %v1032_v48 = vpop.f32.mrf.mxu1 }
 0x793   : > { %v626_v49 = vpop.f32.mrf.mxu1 }
 0x794   : > { %v1090_v50 = vpack.i.bf16 %v626_v49, %v623_v47 }
 0x79d   : > { %v1039_v51 = vpop.f32.mrf.mxu1 }
 0x79e   : > { %v700_v59 = vadd.f32 %v1039_v51, %v1220_v18 }
 0x79f   : > { %v691_v52 = vpop.f32.mrf.mxu1 }
 0x7a0   : > { %v692_v53 = vadd.f32 %v691_v52, %v1220_v18  ;;  %v711_v4 = vsel %vm206_vm2, %v700_v59, -inf }
 0x7a1   : > { %v1040_v56 = vpop.f32.mrf.mxu1 }
 0x7a2   : > { %v705_v60 = vsel %vm206_vm2, %v692_v53, -inf }
 0x7a3   : > { %v694_v61 = vpop.f32.mrf.mxu1  ;;  %706 = vmax.xlane.f32.xlu0 %v705_v60 }
 0x7a4   : > { %v695_v62 = vadd.f32 %v694_v61, %v1220_v18 }
 0x7a6   : > { %v708_v63 = vsel %vm206_vm2, %v695_v62, -inf }
 0x7a7   : > { %709 = vmax.xlane.f32.xlu1 %v708_v63  ;;  %712 = vmax.xlane.f32.xlu0 %v711_v4 }
 0x82c   : > { %v707_v6 = vpop.xlane.xlu0 %706 }
 0x82d   : > { %v714_v8 = vsub.f32 %v692_v53, %v707_v6 }
 0x82f   : > { %v717_v16 = vmul.f32 1.442695, %v714_v8 }
 0x830   : > { %v710_v9 = vpop.xlane.xlu1 %709  ;;  %v713_v10 = vpop.xlane.xlu0 %712 }
 0x831   : > { %v715_v11 = vsub.f32 %v695_v62, %v710_v9  ;;  %v716_v12 = vsub.f32 %v700_v59, %v713_v10 }
 0x833   : > { %v719_v13 = vmul.f32 1.442695, %v715_v11  ;;  %v721_v15 = vmul.f32 1.442695, %v716_v12 }
 0x835   : > { %1139 = vpow2.f32 %v719_v13 }
 0x836   : > { %1141 = vpow2.f32 %v721_v15 }
 0x837   : > { %1143 = vpow2.f32 %v717_v16 }
 0x842   : > { %v1140_v17 = vpop.eup %1139 }
 0x843   : > { %v1142_v18 = vpop.eup %1141  ;;  %v726_v19 = vsel %vm206_vm2, %v1140_v17, 0.0 }
 0x844   : > { %727 = vadd.xlane.f32.xlu1 %v726_v19  ;;  %v729_v20 = vsel %vm206_vm2, %v1142_v18, 0.0  ;;  %v1144_v21 = vpop.eup %1143 }
 0x845   : > { %730 = vadd.xlane.f32.xlu0 %v729_v20  ;;  %v723_v22 = vsel %vm206_vm2, %v1144_v21, 0.0 }
 0x849   : > { %724 = vadd.xlane.f32.xlu0 %v723_v22 }
 0x855   : > { %742 = vrot.lane.b32.xlu1 %v1202_v2, %s1170_s22 }
 0x859   : > { %1086 = vrot.lane.b32.xlu1 %v1085_v58, %s1171_s23 }
 0x85d   : > { %809 = vrot.lane.b32.xlu1 %v1280_v54, %s1171_s23 }
 0x85f   : > { %740 = vrot.lane.b32.xlu0 %v1200_v1, %s1170_s22 }
 0x861   : > { %821 = vrot.lane.b32.xlu1 %v1031_v46, %s1172_s24 }
 0x863   : > { %1091 = vrot.lane.b32.xlu0 %v1090_v50, %s1172_s24 }
 0x8cd   : > { %v728_v23 = vpop.xlane.xlu1 %727 }
 0x8ce   : > { %v731_v24 = vpop.xlane.xlu0 %730 }
 0x8cf   : > { %1145 = vrcp.f32 %v731_v24 }
 0x8d0   : > { %1147 = vrcp.f32 %v728_v23 }
 0x8d1   : > { %v743_v25 = vpop.permute.xlu1 %742 }
 0x8d2   : > { %v752_v26 = vsel %vm253_vm3, %v743_v25, 0  ;;  %v725_v2 = vpop.xlane.xlu0 %724  ;;  %1060 = vmatprep.subr.msk.bf16.mxu0 %vm253_vm3, %v743_v25 }
 0x8d3   : > { %1149 = vrcp.f32 %v725_v2  ;;  %1042 = vmatpush3.bf16.msra.mxu0 %v752_v26 }
 0x8d5   : > { %v1087_v36 = vpop.permute.xlu1 %1086 }
 0x8d6   : > { %v741_v55 = vpop.permute.xlu0 %740  ;;  %v1089_v43 = vunpack.i.h.bf16 %v1087_v36  ;;  %v1088_v44 = vunpack.i.l.bf16 %v1087_v36 }
 0x8d7   : > { %1043 = vmatprep.subr.bf16.mxu0 %v741_v55 }
 0x8d8   : > { %1044 = vmatpush3.bf16.msra.mxu0 %v741_v55  ;;  %v839_v47 = vsel %vm145_vm0, %v1251_v5, %v1089_v43  ;;  %v838_v48 = vsel %vm145_vm0, %v1249_v3, %v1088_v44 }
 0x8d9   : > { %v810_v14 = vpop.permute.xlu1 %809 }
 0x8da   : > { %v840_v38 = vsel %vm145_vm0, %v1247_v0, %v810_v14  ;;  %v1092_v42 = vpop.permute.xlu0 %1091 }
 0x8db   : > { %v1094_v45 = vunpack.i.h.bf16 %v1092_v42  ;;  %v1093_v0 = vunpack.i.l.bf16 %v1092_v42 }
 0x8dc   : > { %v1146_v54 = vpop.eup %1145 }
 0x8dd   : > { %v1148_v1 = vpop.eup %1147  ;;  %v737_v58 = vmul.f32 %v1146_v54, %v1142_v18  ;;  %v822_v37 = vpop.permute.xlu1 %821  ;;  %v842_v51 = vsel %vm841_vm4, %v838_v48, %v1093_v0  ;;  %v843_v52 = vsel %vm841_vm4, %v839_v47, %v1094_v45 }
 0x8de   : > { %v736_v28 = vmul.f32 %v1148_v1, %v1140_v17  ;;  %v844_v39 = vsel %vm841_vm4, %v840_v38, %v822_v37 }
 0x8df   : > { %v739_v30 = vpack.c.bf16 %v737_v58, %v737_v58 }
 0x8e0   : > { %v1150_v57 = vpop.eup %1149 }
 0x8e1   : > { %v735_v27 = vmul.f32 %v1150_v57, %v1144_v21 }
 0x8e3   : > { %v738_v29 = vpack.c.bf16 %v736_v28, %v735_v27 }
 0x8e5   : > { %1045 = vmatprep.mubr.msk.bf16.mxu0 %vm206_vm2, %v738_v29 }
 0x8e6   : > { %1046 = vmatmul.mubr.msk.bf16.vlgmr.msra.gmra.mxu0 %vm206_vm2, %v739_v30 }
 0x9a6   : > { %v1047_v31 = vpop.f32.mrf.mxu0 }
 0x9a7   : > { %833 = vrot.lane.b32.xlu1 %v1047_v31, %s1173_s25 }
 0x9a8   : > { %v788_v32 = vpop.f32.mrf.mxu0 }
 0x9aa   : > { %v1048_v33 = vpop.f32.mrf.mxu0 }
 0x9ac   : > { %v791_v34 = vpop.f32.mrf.mxu0 }
 0x9ad   : > { %v1095_v35 = vpack.i.bf16 %v791_v34, %v788_v32 }
 0x9af   : > { %1096 = vrot.lane.b32.xlu0 %v1095_v35, %s1173_s25 }
 0xa19   : > { %v834_v40 = vpop.permute.xlu1 %833 }
 0xa1a   : > { %v847_v7 = vsel %vm206_vm2, %v844_v39, %v834_v40 }
 0xa1b   : > { %v952_v41 = vpack.c.bf16 %v847_v7, %v847_v7 }
 0xa1d   : > { %864 = vst.msk [vmem:[%s116_s28 + $0x8] sm:$0xf] %vm861_vm5, %v952_v41 }
 0xa21   : > { %v1097_v46 = vpop.permute.xlu0 %1096 }
 0xa22   : > { %v1099_v49 = vunpack.i.h.bf16 %v1097_v46  ;;  %v1098_v50 = vunpack.i.l.bf16 %v1097_v46 }
 0xa24   : > { %v845_v53 = vsel %vm206_vm2, %v842_v51, %v1098_v50  ;;  %v846_v56 = vsel %vm206_vm2, %v843_v52, %v1099_v49 }
 0xa25   : > { %v950_v59 = vpack.c.bf16 %v845_v53, %v845_v53  ;;  %v951_v60 = vpack.c.bf16 %v846_v56, %v846_v56 }
 0xa27   : > { %862 = vst.msk [vmem:[%s116_s28] sm:$0xf] %vm861_vm5, %v950_v59  ;;  %863 = vst.msk [vmem:[%s116_s28 + $0x4] sm:$0xf] %vm861_vm5, %v951_v60 }
 0xa28 PF: > { %s11_s6 = sadd.s32 1, %s1157_s6  }
 0xa29   : > { %p8_p4 = scmp.ge.s32.totalorder %s11_s6, 4  }
 0xa2b   :  { %10 = sbr.rel (!%p8_p4) target bundleno = 1 (0x1), region = 54 }

// kernel: build_transformer_forward.15
= control target key start
LH: loop header
LB: loop body
LE: loop exit
PB: predicated region body
PF: predicated region fallthrough
CT: control target
= control target key end

     0   :  { %vm22_vm0 = vcmask 261120   ;;  %v293_v0 = vmov 0.0   ;;  %vm294_vm1 = vmmov 0   ;;  %vm215_vm2 = vcmask 257024   ;;  %s386_s1 = inlined_call_operand.vmem [shape: bf16[32,32], index: 1, kind: input, shape index: {}]   ;;  %s387_s0 = inlined_call_operand.vmem [shape: bf16[48,32], index: 0, kind: input, shape index: {}]   ;;  %s388_s3 = inlined_call_operand.vmem [shape: bf16[48,32], index: 3, kind: input, shape index: {}]   ;;  %s389_s2 = inlined_call_operand.vmem [shape: f32[1,32], index: 2, kind: input, shape index: {}]   ;;  %s390_s4 = inlined_call_operand.vmem [shape: bf16[48,32], index: 4, kind: output, shape index: {}]  }
   0x1   :  { %282 = vmatprep.subr.bf16.mxu1 %v293_v0  ;;  %v288_v1 = vld [vmem:[%s386_s1 + $0x8] sm:$0xff]   ;;  %266 = vmatprep.subr.bf16.mxu0 %v293_v0  ;;  %23 = vst.msk [vmem:[#allocation2] sm:$0xff] %vm22_vm0, %v293_v0  ;;  %24 = vst.msk [vmem:[#allocation2 + $0x8] sm:$0xff] %vm22_vm0, %v293_v0  ;;  %v289_v2 = vld [vmem:[%s386_s1] sm:$0xff]  }
   0x2   :  { %25 = vst.msk [vmem:[#allocation2 + $0x10] sm:$0xff] %vm22_vm0, %v293_v0  ;;  %26 = vst.msk [vmem:[#allocation2 + $0x18] sm:$0xff] %vm22_vm0, %v293_v0  ;;  %274 = vmatprep.mubr.msk.bf16.mxu1 %vm294_vm1, %v293_v0  ;;  %270 = vmatprep.mubr.msk.bf16.mxu0 %vm294_vm1, %v293_v0  ;;  %v290_v3 = vld [vmem:[%s387_s0 + $0x8] sm:$0xff]   ;;  %v291_v4 = vld [vmem:[%s387_s0] sm:$0xff]  }
   0x3   :  { %27 = vst.msk [vmem:[#allocation2 + $0x20] sm:$0xff] %vm22_vm0, %v293_v0  ;;  %28 = vst.msk [vmem:[#allocation2 + $0x28] sm:$0xff] %vm22_vm0, %v293_v0  ;;  %284 = vmatpush3.bf16.msra.mxu1 %v288_v1  ;;  %267 = vmatpush3.bf16.msra.mxu0 %v288_v1  ;;  %v292_v5 = vld [vmem:[%s387_s0 + $0x10] sm:$0xff]   ;;  %v259_v20 = vld [vmem:[%s388_s3 + $0x8] sm:$0xff]  }
   0x4   :  { %283 = vmatprep.subr.bf16.mxu1 %v293_v0  ;;  %268 = vmatprep.subr.bf16.mxu0 %v293_v0  ;;  %v248_v21 = vld [vmem:[%s388_s3] sm:$0xff]   ;;  %v253_v27 = vunpack.c.l.bf16 %v259_v20  ;;  %v254_v36 = vunpack.c.h.bf16 %v259_v20  ;;  %v260_v44 = vld [vmem:[%s388_s3 + $0x10] sm:$0xff]  }
   0x5   :  { %v234_v25 = vld [vmem:[%s389_s2] ss:$0 sm:$0xff]  ;;  %v249_v28 = vunpack.c.l.bf16 %v248_v21  ;;  %v250_v40 = vunpack.c.h.bf16 %v248_v21  ;;  %v257_v52 = vunpack.c.l.bf16 %v260_v44  ;;  %v258_v58 = vunpack.c.h.bf16 %v260_v44 }
   0x7   :  { %285 = vmatpush3.bf16.msra.mxu1 %v289_v2  ;;  %269 = vmatpush3.bf16.msra.mxu0 %v289_v2 }
   0x8   :  { %v29_v7 = vld [vmem:[#allocation2] sm:$0xff]  ;;  %v30_v15 = vld [vmem:[#allocation2 + $0x8] sm:$0xff] }
   0x9   :  { %v31_v6 = vld [vmem:[#allocation2 + $0x10] sm:$0xff]  ;;  %v32_v14 = vld [vmem:[#allocation2 + $0x18] sm:$0xff] }
   0xa   :  { %275 = vmatmul.mubr.msk.bf16.vlgmr.msra.gmra.mxu1 %vm22_vm0, %v290_v3  ;;  %271 = vmatmul.mubr.msk.bf16.vlgmr.msra.gmra.mxu0 %vm22_vm0, %v291_v4  ;;  %v33_v24 = vld [vmem:[#allocation2 + $0x20] sm:$0xff]  ;;  %v34_v33 = vld [vmem:[#allocation2 + $0x28] sm:$0xff] }
   0xb   :  { %278 = vmatprep.mubr.msk.bf16.mxu1 %vm294_vm1, %v293_v0 }
  0x12   :  { %279 = vmatmul.mubr.msk.bf16.gmra.mxu1 %vm22_vm0, %v292_v5 }
  0xca   :  { %v124_v8 = vpop.f32.mrf.mxu1  ;;  %v116_v9 = vpop.f32.mrf.mxu0 }
  0xcb   :  { %v141_v10 = vadd.f32 %v124_v8, %v31_v6  ;;  %v139_v11 = vadd.f32 %v116_v9, %v29_v7 }
  0xcc   :  { %v276_v12 = vpop.f32.mrf.mxu1  ;;  %v272_v13 = vpop.f32.mrf.mxu0 }
  0xcd   :  { %147 = vst.msk [vmem:[#allocation2 + $0x10] sm:$0xff] %vm22_vm0, %v141_v10  ;;  %145 = vst.msk [vmem:[#allocation2] sm:$0xff] %vm22_vm0, %v139_v11 }
  0xce   :  { %v127_v16 = vpop.f32.mrf.mxu1  ;;  %v119_v17 = vpop.f32.mrf.mxu0 }
  0xcf   :  { %v142_v18 = vadd.f32 %v127_v16, %v32_v14  ;;  %v140_v19 = vadd.f32 %v119_v17, %v30_v15 }
  0xd0   :  { %v277_v22 = vpop.f32.mrf.mxu1  ;;  %v273_v23 = vpop.f32.mrf.mxu0 }
  0xd1   :  { %148 = vst.msk [vmem:[#allocation2 + $0x18] sm:$0xff] %vm22_vm0, %v142_v18  ;;  %146 = vst.msk [vmem:[#allocation2 + $0x8] sm:$0xff] %vm22_vm0, %v140_v19 }
  0xd2   :  { %v132_v26 = vpop.f32.mrf.mxu1 }
  0xd3   :  { %v143_v29 = vadd.f32 %v132_v26, %v33_v24 }
  0xd4   :  { %v156_v30 = vld [vmem:[#allocation2 + $0x10] sm:$0xff]  ;;  %v154_v31 = vld [vmem:[#allocation2] sm:$0xff]  ;;  %v280_v32 = vpop.f32.mrf.mxu1 }
  0xd5   :  { %v169_v34 = vadd.f32 %v234_v25, %v156_v30  ;;  %v167_v35 = vadd.f32 %v234_v25, %v154_v31  ;;  %149 = vst.msk [vmem:[#allocation2 + $0x20] sm:$0xff] %vm22_vm0, %v143_v29 }
  0xd6   :  { %v135_v37 = vpop.f32.mrf.mxu1 }
  0xd7   :  { %v187_v38 = vadd.f32 %v253_v27, %v169_v34  ;;  %v185_v39 = vadd.f32 %v249_v28, %v167_v35  ;;  %v144_v41 = vadd.f32 %v135_v37, %v34_v33 }
  0xd8   :  { %v157_v42 = vld [vmem:[#allocation2 + $0x18] sm:$0xff]  ;;  %v155_v43 = vld [vmem:[#allocation2 + $0x8] sm:$0xff]  ;;  %v281_v45 = vpop.f32.mrf.mxu1 }
  0xd9   :  { %v243_v46 = vpack.c.bf16 %v187_v38, %v187_v38  ;;  %v241_v47 = vpack.c.bf16 %v185_v39, %v185_v39  ;;  %v170_v48 = vadd.f32 %v234_v25, %v157_v42  ;;  %v168_v49 = vadd.f32 %v234_v25, %v155_v43  ;;  %150 = vst.msk [vmem:[#allocation2 + $0x28] sm:$0xff] %vm22_vm0, %v144_v41 }
  0xdb   :  { %218 = vst.msk [vmem:[%s390_s4 + $0x8] sm:$0xf] %vm215_vm2, %v243_v46  ;;  %216 = vst.msk [vmem:[%s390_s4] sm:$0xf] %vm215_vm2, %v241_v47  ;;  %v188_v50 = vadd.f32 %v254_v36, %v170_v48  ;;  %v186_v51 = vadd.f32 %v250_v40, %v168_v49 }
  0xdc   :  { %v158_v53 = vld [vmem:[#allocation2 + $0x20] sm:$0xff] }
  0xdd   :  { %v244_v54 = vpack.c.bf16 %v188_v50, %v188_v50  ;;  %v242_v55 = vpack.c.bf16 %v186_v51, %v186_v51  ;;  %v171_v56 = vadd.f32 %v234_v25, %v158_v53 }
  0xdf   :  { %219 = vst.msk [vmem:[%s390_s4 + $0xc] sm:$0xf] %vm215_vm2, %v244_v54  ;;  %217 = vst.msk [vmem:[%s390_s4 + $0x4] sm:$0xf] %vm215_vm2, %v242_v55  ;;  %v189_v57 = vadd.f32 %v257_v52, %v171_v56 }
  0xe0   :  { %v159_v59 = vld [vmem:[#allocation2 + $0x28] sm:$0xff] }
  0xe1   :  { %v245_v60 = vpack.c.bf16 %v189_v57, %v189_v57  ;;  %v172_v61 = vadd.f32 %v234_v25, %v159_v59 }
  0xe3   :  { %220 = vst.msk [vmem:[%s390_s4 + $0x10] sm:$0xf] %vm215_vm2, %v245_v60  ;;  %v190_v62 = vadd.f32 %v258_v58, %v172_v61 }
  0xe5   :  { %v246_v63 = vpack.c.bf16 %v190_v62, %v190_v62 }
  0xe7   :  { %221 = vst.msk [vmem:[%s390_s4 + $0x14] sm:$0xf] %vm215_vm2, %v246_v63 }

// kernel: build_transformer_forward.23
= control target key start
LH: loop header
LB: loop body
LE: loop exit
PB: predicated region body
PF: predicated region fallthrough
CT: control target
= control target key end

     0   :  { %vm24_vm0 = vcmask 254976   ;;  %s207_s0 = inlined_call_operand.vmem [shape: f32[2,32], index: 0, kind: input, shape index: {}]   ;;  %s208_s1 = inlined_call_operand.vmem [shape: f32[1,32], index: 1, kind: input, shape index: {}]   ;;  %s209_s2 = inlined_call_operand.vmem [shape: f32[1,32], index: 2, kind: input, shape index: {}]   ;;  %s210_s3 = inlined_call_operand.vmem [shape: f32[1,32], index: 3, kind: input, shape index: {}]   ;;  %s211_s4 = inlined_call_operand.vmem [shape: f32[1,32], index: 4, kind: input, shape index: {}]   ;;  %s212_s5 = inlined_call_operand.hbm [shape: f32[2,32], index: 5, kind: output, shape index: {0}]   ;;  %s213_s6 = inlined_call_operand.vmem [shape: f32[2,32], index: 6, kind: output, shape index: {1}]  }
   0x1   :  { %v23_v0 = vld [vmem:[%s207_s0] sm:$0x3] }
   0x2   :  { %12 = vsyncpa [#allocation3], 0  ;;  %v25_v1 = vsel %vm24_vm0, %v23_v0, 0.0  ;;  %v113_v11 = vld [vmem:[%s208_s1] ss:$0 sm:$0xff]  ;;  %s144_s26 = smov [#allocation2]  }
   0x3   :  { %26 = vadd.xlane.f32.xlu0 %v25_v1  ;;  %v114_v13 = vld [vmem:[%s209_s2] ss:$0 sm:$0xff]  ;;  %s101_s27 = sshll.u32 %s144_s26, 4  ;;  %s102_s27 = int_to_ptr.vmem [resolvable:$true] %s101_s27 }
   0x4   :  { %s122_s28 = scalar_lea.vmem %s102_s27, 32  ;;  %p127_p1 = scmp.lt.s32.totalorder %s102_s27, %s102_s27 }
   0x5   :  { %p123_p0 = scmp.ne.s32.totalorder %s102_s27, %s122_s28  ;;  %p128_p2 = scmp.lt.s32.totalorder %s122_s28, %s122_s28 }
   0x7   :  { %p129_p3 = por %p128_p2, %p127_p1 }
   0x9   :  { %p130_p4 = pnand %p129_p3, %p123_p0 }
  0x8c   :  { %v27_v2 = vpop.xlane.xlu0 %26 }
  0x8d   :  { %v29_v3 = vmul.f32 0.03125, %v27_v2 }
  0x8f   :  { %v30_v4 = vsub.f32 %v23_v0, %v29_v3 }
  0x91   :  { %v31_v5 = vmul.f32 %v30_v4, %v30_v4 }
  0x93   :  { %v32_v6 = vsel %vm24_vm0, %v31_v5, 0.0 }
  0x94   :  { %33 = vadd.xlane.f32.xlu0 %v32_v6 }
 0x11d   :  { %v34_v7 = vpop.xlane.xlu0 %33 }
 0x11e   :  { %v35_v8 = vmul.f32 0.03125, %v34_v7 }
 0x120   :  { %v36_v9 = vadd.f32 1e-06, %v35_v8 }
 0x122   :  { %118 = vrsqrt.f32 %v36_v9 }
 0x12f   :  { %v119_v10 = vpop.eup %118 }
 0x130   :  { %v38_v12 = vmul.f32 %v119_v10, %v30_v4 }
 0x132   :  { %v46_v14 = vmul.f32 %v113_v11, %v38_v12 }
 0x134   :  { %v54_v15 = vadd.f32 %v114_v13, %v46_v14 }
 0x136   :  { %55 = vst.msk [vmem:[#allocation2] sm:$0x3] %vm24_vm0, %v54_v15  ;;  %v56_v16 = vsel %vm24_vm0, %v54_v15, 0.0 }
 0x137   :  { %v57_v17 = vrot.slane %v56_v16, 4 }
 0x138   :  { %133 = shalt.err (!%p130_p4)
}
 0x139   :  { %104 = dma.vmem_to_hbm [thread:$0]  %s102_s27, 32, %s212_s5, [#allocation3]   ;;  %v58_v18 = vadd.f32 %v57_v17, %v56_v16  ;;  %v115_v36 = vld [vmem:[%s210_s3] ss:$0 sm:$0xff] }
 0x13a   :  { %v116_v38 = vld [vmem:[%s211_s4] ss:$0 sm:$0xff] }
 0x13b   :  { %v59_v19 = vrot.slane %v58_v18, 2 }
 0x13d   :  { %v60_v20 = vadd.f32 %v59_v19, %v58_v18 }
 0x13f   :  { %v61_v21 = vrot.slane %v60_v20, 1 }
 0x141   :  { %v62_v22 = vadd.f32 %v61_v21, %v60_v20 }
 0x143   :  { %v64_v23 = vmul.f32 0.5, %v62_v22 }
 0x145   :  { %v65_v24 = vsub.f32 %v54_v15, %v64_v23 }
 0x147   :  { %v66_v25 = vmul.f32 %v65_v24, %v65_v24 }
 0x149   :  { %v67_v26 = vsel %vm24_vm0, %v66_v25, 0.0 }
 0x14a   :  { %v68_v27 = vrot.slane %v67_v26, 4 }
 0x14c   :  { %v69_v28 = vadd.f32 %v68_v27, %v67_v26 }
 0x14e   :  { %v70_v29 = vrot.slane %v69_v28, 2 }
 0x150   :  { %v71_v30 = vadd.f32 %v70_v29, %v69_v28 }
 0x152   :  { %v72_v31 = vrot.slane %v71_v30, 1 }
 0x154   :  { %v73_v32 = vadd.f32 %v72_v31, %v71_v30 }
 0x156   :  { %v74_v33 = vmul.f32 0.5, %v73_v32 }
 0x158   :  { %v75_v34 = vadd.f32 1e-05, %v74_v33 }
 0x15a   :  { %120 = vrsqrt.f32 %v75_v34 }
 0x167   :  { %v121_v35 = vpop.eup %120 }
 0x168   :  { %v77_v37 = vmul.f32 %v121_v35, %v65_v24 }
 0x16a   :  { %v85_v39 = vmul.f32 %v115_v36, %v77_v37 }
 0x16c   :  { %v93_v40 = vadd.f32 %v116_v38, %v85_v39 }
 0x16e   :  { %94 = vst.msk [vmem:[%s213_s6] sm:$0x3] %vm24_vm0, %v93_v40 }
 0x16f   :  { %142 = dma.done.wait [#allocation3], 32  }
 0x170   :  { %143 = vsyncadd [#allocation3], 4294967264 }
 0x171   :  { %112 = vsyncpa [#allocation3], 1 }

// kernel: build_transformer_forward.16
= control target key start
LH: loop header
LB: loop body
LE: loop exit
PB: predicated region body
PF: predicated region fallthrough
CT: control target
= control target key end

     0   :  { %vm33_vm0 = vcmask 261120   ;;  %v423_v45 = vmov 0.0   ;;  %vm424_vm1 = vmmov 0   ;;  %s557_s0 = inlined_call_operand.vmem [shape: bf16[48,32], index: 0, kind: input, shape index: {}]   ;;  %s558_s3 = inlined_call_operand.vmem [shape: bf16[32,128], index: 3, kind: input, shape index: {}]   ;;  %s559_s1 = inlined_call_operand.vmem [shape: f32[1,32], index: 1, kind: input, shape index: {}]   ;;  %s560_s2 = inlined_call_operand.vmem [shape: f32[1,32], index: 2, kind: input, shape index: {}]   ;;  %s561_s4 = inlined_call_operand.vmem [shape: f32[1,128], index: 4, kind: input, shape index: {}]   ;;  %s562_s5 = inlined_call_operand.vmem [shape: bf16[48,128], index: 5, kind: output, shape index: {}]  }
   0x1   :  { %v366_v0 = vld [vmem:[%s557_s0 + $0x8] sm:$0xff]   ;;  %v340_v1 = vld [vmem:[%s557_s0] sm:$0xff]   ;;  %v367_v5 = vld [vmem:[%s557_s0 + $0x10] sm:$0xff]   ;;  %391 = vmatprep.subr.bf16.mxu1 %v423_v45  ;;  %375 = vmatprep.subr.bf16.mxu0 %v423_v45 }
   0x2   :  { %v345_v2 = vunpack.c.l.bf16 %v366_v0  ;;  %v346_v3 = vunpack.c.h.bf16 %v366_v0  ;;  %v341_v4 = vunpack.c.l.bf16 %v340_v1  ;;  %v342_v6 = vunpack.c.h.bf16 %v340_v1  ;;  %v397_v46 = vld [vmem:[%s558_s3 + $0x8] sm:$0xff]   ;;  %383 = vmatprep.mubr.msk.bf16.mxu1 %vm424_vm1, %v423_v45  ;;  %379 = vmatprep.mubr.msk.bf16.mxu0 %vm424_vm1, %v423_v45  ;;  %v398_v47 = vld [vmem:[%s558_s3] sm:$0xff]  }
   0x3   :  { %v349_v10 = vunpack.c.l.bf16 %v367_v5  ;;  %v350_v12 = vunpack.c.h.bf16 %v367_v5  ;;  %393 = vmatpush3.bf16.msra.mxu1 %v397_v46  ;;  %376 = vmatpush3.bf16.msra.mxu0 %v397_v46 }
   0x4   :  { %v40_v7 = vsel %vm33_vm0, %v345_v2, 0.0  ;;  %v34_v8 = vsel %vm33_vm0, %v341_v4, 0.0  ;;  %v43_v9 = vsel %vm33_vm0, %v346_v3, 0.0  ;;  %v37_v11 = vsel %vm33_vm0, %v342_v6, 0.0  ;;  %392 = vmatprep.subr.bf16.mxu1 %v423_v45  ;;  %377 = vmatprep.subr.bf16.mxu0 %v423_v45 }
   0x5   :  { %41 = vadd.xlane.f32.xlu0 %v40_v7  ;;  %35 = vadd.xlane.f32.xlu1 %v34_v8  ;;  %v46_v13 = vsel %vm33_vm0, %v349_v10, 0.0  ;;  %v49_v14 = vsel %vm33_vm0, %v350_v12, 0.0 }
   0x7   :  { %394 = vmatpush3.bf16.msra.mxu1 %v398_v47  ;;  %378 = vmatpush3.bf16.msra.mxu0 %v398_v47 }
   0x9   :  { %44 = vadd.xlane.f32.xlu0 %v43_v9  ;;  %38 = vadd.xlane.f32.xlu1 %v37_v11 }
   0xd   :  { %47 = vadd.xlane.f32.xlu0 %v46_v13  ;;  %50 = vadd.xlane.f32.xlu1 %v49_v14 }
  0x8e   :  { %v42_v15 = vpop.xlane.xlu0 %41  ;;  %v36_v16 = vpop.xlane.xlu1 %35 }
  0x8f   :  { %v55_v17 = vmul.f32 0.03125, %v42_v15  ;;  %v53_v18 = vmul.f32 0.03125, %v36_v16 }
  0x91   :  { %v470_v19 = vsub.f32 %v345_v2, %v55_v17  ;;  %v472_v20 = vsub.f32 %v341_v4, %v53_v18  ;;  %v319_v4 = vld [vmem:[%s559_s1] ss:$0 sm:$0xff] }
  0x92   :  { %v45_v21 = vpop.xlane.xlu0 %44  ;;  %v39_v22 = vpop.xlane.xlu1 %38 }
  0x93   :  { %v56_v23 = vmul.f32 0.03125, %v45_v21  ;;  %v67_v24 = vmul.f32 %v470_v19, %v470_v19  ;;  %v54_v25 = vmul.f32 0.03125, %v39_v22  ;;  %v65_v26 = vmul.f32 %v472_v20, %v472_v20 }
  0x95   :  { %v478_v27 = vsub.f32 %v346_v3, %v56_v23  ;;  %v77_v28 = vsel %vm33_vm0, %v67_v24, 0.0  ;;  %v481_v29 = vsub.f32 %v342_v6, %v54_v25  ;;  %v71_v31 = vsel %vm33_vm0, %v65_v26, 0.0 }
  0x96   :  { %78 = vadd.xlane.f32.xlu0 %v77_v28  ;;  %v48_v30 = vpop.xlane.xlu0 %47  ;;  %v51_v32 = vpop.xlane.xlu1 %50 }
  0x97   :  { %v57_v33 = vmul.f32 0.03125, %v48_v30  ;;  %v68_v34 = vmul.f32 %v478_v27, %v478_v27  ;;  %v58_v35 = vmul.f32 0.03125, %v51_v32  ;;  %v66_v36 = vmul.f32 %v481_v29, %v481_v29 }
  0x99   :  { %v488_v37 = vsub.f32 %v349_v10, %v57_v33  ;;  %v80_v38 = vsel %vm33_vm0, %v68_v34, 0.0  ;;  %v491_v39 = vsub.f32 %v350_v12, %v58_v35  ;;  %v74_v41 = vsel %vm33_vm0, %v66_v36, 0.0  ;;  %v320_v10 = vld [vmem:[%s560_s2] ss:$0 sm:$0xff] }
  0x9a   :  { %81 = vadd.xlane.f32.xlu1 %v80_v38  ;;  %72 = vadd.xlane.f32.xlu0 %v71_v31  ;;  %v321_v31 = vld [vmem:[%s561_s4] ss:$0 sm:$0xff] }
  0x9b   :  { %v69_v40 = vmul.f32 %v488_v37, %v488_v37  ;;  %v70_v42 = vmul.f32 %v491_v39, %v491_v39 }
  0x9d   :  { %v83_v43 = vsel %vm33_vm0, %v69_v40, 0.0  ;;  %v86_v44 = vsel %vm33_vm0, %v70_v42, 0.0 }
  0x9e   :  { %84 = vadd.xlane.f32.xlu0 %v83_v43  ;;  %75 = vadd.xlane.f32.xlu1 %v74_v41 }
  0xa2   :  { %87 = vadd.xlane.f32.xlu1 %v86_v44 }
 0x11f   :  { %v79_v48 = vpop.xlane.xlu0 %78 }
 0x120   :  { %v91_v49 = vmul.f32 0.03125, %v79_v48 }
 0x122   :  { %v97_v50 = vadd.f32 1e-06, %v91_v49 }
 0x123   :  { %v73_v51 = vpop.xlane.xlu0 %72  ;;  %v82_v52 = vpop.xlane.xlu1 %81 }
 0x124   :  { %399 = vrsqrt.f32 %v97_v50  ;;  %v89_v53 = vmul.f32 0.03125, %v73_v51  ;;  %v92_v54 = vmul.f32 0.03125, %v82_v52 }
 0x126   :  { %v95_v55 = vadd.f32 1e-06, %v89_v53  ;;  %v98_v56 = vadd.f32 1e-06, %v92_v54 }
 0x127   :  { %v85_v57 = vpop.xlane.xlu0 %84  ;;  %v76_v58 = vpop.xlane.xlu1 %75 }
 0x128   :  { %401 = vrsqrt.f32 %v95_v55  ;;  %v93_v59 = vmul.f32 0.03125, %v85_v57  ;;  %v90_v60 = vmul.f32 0.03125, %v76_v58 }
 0x129   :  { %403 = vrsqrt.f32 %v98_v56 }
 0x12a   :  { %v99_v61 = vadd.f32 1e-06, %v93_v59  ;;  %v96_v62 = vadd.f32 1e-06, %v90_v60 }
 0x12b   :  { %v88_v63 = vpop.xlane.xlu1 %87 }
 0x12c   :  { %405 = vrsqrt.f32 %v99_v61  ;;  %v94_v0 = vmul.f32 0.03125, %v88_v63 }
 0x12d   :  { %407 = vrsqrt.f32 %v96_v62 }
 0x12e   :  { %v100_v1 = vadd.f32 1e-06, %v94_v0 }
 0x130   :  { %409 = vrsqrt.f32 %v100_v1 }
 0x131   :  { %v400_v2 = vpop.eup %399 }
 0x132   :  { %v109_v3 = vmul.f32 %v400_v2, %v470_v19 }
 0x134   :  { %v122_v8 = vmul.f32 %v319_v4, %v109_v3 }
 0x135   :  { %v402_v5 = vpop.eup %401 }
 0x136   :  { %v404_v6 = vpop.eup %403  ;;  %v107_v9 = vmul.f32 %v402_v5, %v472_v20  ;;  %v135_v15 = vadd.f32 %v320_v10, %v122_v8 }
 0x137   :  { %v110_v7 = vmul.f32 %v404_v6, %v478_v27 }
 0x138   :  { %v120_v18 = vmul.f32 %v319_v4, %v107_v9 }
 0x139   :  { %v406_v11 = vpop.eup %405  ;;  %v123_v12 = vmul.f32 %v319_v4, %v110_v7 }
 0x13a   :  { %v408_v13 = vpop.eup %407  ;;  %v111_v14 = vmul.f32 %v406_v11, %v488_v37  ;;  %v133_v24 = vadd.f32 %v320_v10, %v120_v18 }
 0x13b   :  { %v136_v16 = vadd.f32 %v320_v10, %v123_v12  ;;  %v108_v17 = vmul.f32 %v408_v13, %v481_v29 }
 0x13c   :  { %v124_v20 = vmul.f32 %v319_v4, %v111_v14 }
 0x13d   :  { %v410_v19 = vpop.eup %409  ;;  %v140_v21 = vpack.c.bf16 %v136_v16, %v135_v15  ;;  %v121_v22 = vmul.f32 %v319_v4, %v108_v17 }
 0x13e   :  { %v112_v23 = vmul.f32 %v410_v19, %v491_v39  ;;  %v137_v28 = vadd.f32 %v320_v10, %v124_v20 }
 0x13f   :  { %384 = vmatmul.mubr.msk.bf16.vlgmr.msra.gmra.mxu1 %vm33_vm0, %v140_v21  ;;  %v134_v25 = vadd.f32 %v320_v10, %v121_v22 }
 0x140   :  { %387 = vmatprep.mubr.msk.bf16.mxu1 %vm424_vm1, %v423_v45  ;;  %v125_v26 = vmul.f32 %v319_v4, %v112_v23 }
 0x141   :  { %v139_v27 = vpack.c.bf16 %v134_v25, %v133_v24 }
 0x142   :  { %v138_v30 = vadd.f32 %v320_v10, %v125_v26 }
 0x143   :  { %380 = vmatmul.mubr.msk.bf16.vlgmr.msra.gmra.mxu0 %vm33_vm0, %v139_v27 }
 0x144   :  { %v141_v29 = vpack.c.bf16 %v138_v30, %v137_v28 }
 0x147   :  { %388 = vmatmul.mubr.msk.bf16.gmra.mxu1 %vm33_vm0, %v141_v29 }
 0x1ff   :  { %v216_v32 = vpop.f32.mrf.mxu1 }
 0x200   :  { %v534_v33 = vadd.f32 %v321_v31, %v216_v32 }
 0x201   :  { %v385_v34 = vpop.f32.mrf.mxu1 }
 0x202   :  { %v233_v35 = vmul.f32 %v534_v33, %v534_v33 }
 0x203   :  { %v208_v36 = vpop.f32.mrf.mxu0  ;;  %v219_v37 = vpop.f32.mrf.mxu1 }
 0x204   :  { %v239_v38 = vmul.f32 %v233_v35, %v534_v33  ;;  %v539_v39 = vadd.f32 %v321_v31, %v208_v36  ;;  %v220_v40 = vadd.f32 %v321_v31, %v219_v37 }
 0x205   :  { %v381_v41 = vpop.f32.mrf.mxu0  ;;  %v386_v42 = vpop.f32.mrf.mxu1 }
 0x206   :  { %v245_v43 = vmul.f32 0.044715, %v239_v38  ;;  %v231_v44 = vmul.f32 %v539_v39, %v539_v39  ;;  %v234_v45 = vmul.f32 %v220_v40, %v220_v40 }
 0x207   :  { %v211_v46 = vpop.f32.mrf.mxu0  ;;  %v224_v47 = vpop.f32.mrf.mxu1 }
 0x208   :  { %v251_v48 = vadd.f32 %v245_v43, %v534_v33  ;;  %v237_v49 = vmul.f32 %v231_v44, %v539_v39  ;;  %v240_v50 = vmul.f32 %v234_v45, %v220_v40  ;;  %v212_v51 = vadd.f32 %v321_v31, %v211_v46 }
 0x209   :  { %v225_v52 = vadd.f32 %v321_v31, %v224_v47  ;;  %v382_v53 = vpop.f32.mrf.mxu0  ;;  %v389_v54 = vpop.f32.mrf.mxu1 }
 0x20a   :  { %v257_v55 = vmul.f32 0.7978846, %v251_v48  ;;  %v243_v56 = vmul.f32 0.044715, %v237_v49  ;;  %v246_v57 = vmul.f32 0.044715, %v240_v50  ;;  %v232_v58 = vmul.f32 %v212_v51, %v212_v51 }
 0x20b   :  { %v235_v59 = vmul.f32 %v225_v52, %v225_v52  ;;  %v227_v60 = vpop.f32.mrf.mxu1 }
 0x20c   :  { %411 = vtanh.f32 %v257_v55  ;;  %v249_v61 = vadd.f32 %v243_v56, %v539_v39  ;;  %v252_v62 = vadd.f32 %v246_v57, %v220_v40  ;;  %v238_v63 = vmul.f32 %v232_v58, %v212_v51 }
 0x20d   :  { %v241_v0 = vmul.f32 %v235_v59, %v225_v52  ;;  %v228_v1 = vadd.f32 %v321_v31, %v227_v60  ;;  %v390_v2 = vpop.f32.mrf.mxu1 }
 0x20e   :  { %v255_v3 = vmul.f32 0.7978846, %v249_v61  ;;  %v258_v4 = vmul.f32 0.7978846, %v252_v62  ;;  %v244_v5 = vmul.f32 0.044715, %v238_v63 }
 0x20f   :  { %v247_v6 = vmul.f32 0.044715, %v241_v0  ;;  %v236_v7 = vmul.f32 %v228_v1, %v228_v1 }
 0x210   :  { %413 = vtanh.f32 %v255_v3  ;;  %v250_v8 = vadd.f32 %v244_v5, %v212_v51 }
 0x211   :  { %415 = vtanh.f32 %v258_v4  ;;  %v253_v9 = vadd.f32 %v247_v6, %v225_v52  ;;  %v242_v10 = vmul.f32 %v236_v7, %v228_v1 }
 0x212   :  { %v256_v11 = vmul.f32 0.7978846, %v250_v8 }
 0x213   :  { %v259_v12 = vmul.f32 0.7978846, %v253_v9  ;;  %v248_v13 = vmul.f32 0.044715, %v242_v10 }
 0x214   :  { %417 = vtanh.f32 %v256_v11 }
 0x215   :  { %419 = vtanh.f32 %v259_v12  ;;  %v254_v14 = vadd.f32 %v248_v13, %v228_v1 }
 0x217   :  { %v260_v15 = vmul.f32 0.7978846, %v254_v14 }
 0x219   :  { %v412_v16 = vpop.eup %411  ;;  %421 = vtanh.f32 %v260_v15 }
 0x21a   :  { %v269_v17 = vadd.f32 1.0, %v412_v16 }
 0x21c   :  { %v275_v22 = vmul.f32 0.5, %v269_v17 }
 0x21d   :  { %v414_v18 = vpop.eup %413 }
 0x21e   :  { %v416_v19 = vpop.eup %415  ;;  %v267_v21 = vadd.f32 1.0, %v414_v18  ;;  %v281_v28 = vmul.f32 %v275_v22, %v534_v33 }
 0x21f   :  { %v270_v23 = vadd.f32 1.0, %v416_v19 }
 0x220   :  { %v273_v26 = vmul.f32 0.5, %v267_v21 }
 0x221   :  { %v418_v20 = vpop.eup %417  ;;  %v276_v24 = vmul.f32 0.5, %v270_v23 }
 0x222   :  { %v420_v25 = vpop.eup %419  ;;  %v268_v27 = vadd.f32 1.0, %v418_v20  ;;  %v279_v35 = vmul.f32 %v273_v26, %v539_v39 }
 0x223   :  { %v282_v30 = vmul.f32 %v276_v24, %v220_v40  ;;  %v271_v29 = vadd.f32 1.0, %v420_v25 }
 0x224   :  { %v274_v31 = vmul.f32 0.5, %v268_v27 }
 0x225   :  { %v359_v32 = vpack.c.bf16 %v282_v30, %v281_v28  ;;  %v277_v37 = vmul.f32 0.5, %v271_v29 }
 0x226   :  { %v422_v34 = vpop.eup %421  ;;  %v280_v36 = vmul.f32 %v274_v31, %v212_v51 }
 0x227   :  { %368 = vst [vmem:[%s562_s5 + $0x8] sm:$0xff] %v359_v32   ;;  %v272_v38 = vadd.f32 1.0, %v422_v34  ;;  %v283_v33 = vmul.f32 %v277_v37, %v225_v52 }
 0x228   :  { %v354_v41 = vpack.c.bf16 %v280_v36, %v279_v35 }
 0x229   :  { %v278_v42 = vmul.f32 0.5, %v272_v38 }
 0x22a   :  { %355 = vst [vmem:[%s562_s5] sm:$0xff] %v354_v41  }
 0x22b   :  { %v284_v40 = vmul.f32 %v278_v42, %v228_v1 }
 0x22d   :  { %v364_v43 = vpack.c.bf16 %v284_v40, %v283_v33 }
 0x22f   :  { %369 = vst [vmem:[%s562_s5 + $0x10] sm:$0xff] %v364_v43  }

// kernel: build_transformer_forward.17
= control target key start
LH: loop header
LB: loop body
LE: loop exit
PB: predicated region body
PF: predicated region fallthrough
CT: control target
= control target key end

     0   :  { %vm22_vm0 = vcmask 261120   ;;  %v374_v0 = vmov 0.0   ;;  %vm375_vm1 = vmmov 0   ;;  %vm257_vm2 = vcmask 257024   ;;  %s485_s1 = inlined_call_operand.vmem [shape: bf16[128,32], index: 1, kind: input, shape index: {}]   ;;  %s486_s0 = inlined_call_operand.vmem [shape: bf16[48,128], index: 0, kind: input, shape index: {}]   ;;  %s487_s3 = inlined_call_operand.vmem [shape: bf16[48,32], index: 3, kind: input, shape index: {}]   ;;  %s488_s2 = inlined_call_operand.vmem [shape: f32[1,32], index: 2, kind: input, shape index: {}]   ;;  %s489_s4 = inlined_call_operand.vmem [shape: bf16[48,32], index: 4, kind: output, shape index: {}]  }
   0x1   :  { %345 = vmatprep.subr.bf16.mxu1 %v374_v0  ;;  %v363_v1 = vld [vmem:[%s485_s1 + $0x38] sm:$0xff]   ;;  %317 = vmatprep.subr.bf16.mxu0 %v374_v0  ;;  %25 = vst.msk [vmem:[#allocation2 + $0x10] sm:$0xff] %vm22_vm0, %v374_v0  ;;  %23 = vst.msk [vmem:[#allocation2] sm:$0xff] %vm22_vm0, %v374_v0  ;;  %v364_v2 = vld [vmem:[%s485_s1 + $0x30] sm:$0xff]  }
   0x2   :  { %24 = vst.msk [vmem:[#allocation2 + $0x8] sm:$0xff] %vm22_vm0, %v374_v0  ;;  %26 = vst.msk [vmem:[#allocation2 + $0x18] sm:$0xff] %vm22_vm0, %v374_v0  ;;  %337 = vmatprep.mubr.msk.bf16.mxu1 %vm375_vm1, %v374_v0  ;;  %333 = vmatprep.mubr.msk.bf16.mxu0 %vm375_vm1, %v374_v0  ;;  %v365_v3 = vld [vmem:[%s485_s1 + $0x28] sm:$0xff]   ;;  %v366_v4 = vld [vmem:[%s485_s1 + $0x20] sm:$0xff]  }
   0x3   :  { %27 = vst.msk [vmem:[#allocation2 + $0x20] sm:$0xff] %vm22_vm0, %v374_v0  ;;  %28 = vst.msk [vmem:[#allocation2 + $0x28] sm:$0xff] %vm22_vm0, %v374_v0  ;;  %353 = vmatpush3.bf16.msra.mxu1 %v363_v1  ;;  %318 = vmatpush3.bf16.msra.mxu0 %v363_v1  ;;  %v367_v5 = vld [vmem:[%s485_s1 + $0x18] sm:$0xff]   ;;  %v368_v6 = vld [vmem:[%s485_s1 + $0x10] sm:$0xff]  }
   0x4   :  { %346 = vmatprep.subr.bf16.mxu1 %v374_v0  ;;  %319 = vmatprep.subr.bf16.mxu0 %v374_v0  ;;  %v369_v7 = vld [vmem:[%s485_s1 + $0x8] sm:$0xff]   ;;  %v370_v8 = vld [vmem:[%s485_s1] sm:$0xff]   ;;  %v373_v11 = vld [vmem:[%s486_s0 + $0x10] sm:$0xff]  }
   0x5   :  { %v371_v9 = vld [vmem:[%s486_s0 + $0x8] sm:$0xff]   ;;  %v372_v10 = vld [vmem:[%s486_s0] sm:$0xff]   ;;  %v305_v50 = vld [vmem:[%s487_s3 + $0x10] sm:$0xff]  }
   0x6   :  { %v304_v26 = vld [vmem:[%s487_s3 + $0x8] sm:$0xff]   ;;  %v293_v27 = vld [vmem:[%s487_s3] sm:$0xff]   ;;  %v302_v58 = vunpack.c.l.bf16 %v305_v50 }
   0x7   :  { %354 = vmatpush3.bf16.msra.mxu1 %v364_v2  ;;  %320 = vmatpush3.bf16.msra.mxu0 %v364_v2  ;;  %v279_v31 = vld [vmem:[%s488_s2] ss:$0 sm:$0xff]  ;;  %v298_v33 = vunpack.c.l.bf16 %v304_v26  ;;  %v294_v34 = vunpack.c.l.bf16 %v293_v27  ;;  %v299_v42 = vunpack.c.h.bf16 %v304_v26  ;;  %v295_v46 = vunpack.c.h.bf16 %v293_v27 }
   0x8   :  { %347 = vmatprep.subr.bf16.mxu1 %v374_v0  ;;  %321 = vmatprep.subr.bf16.mxu0 %v374_v0  ;;  %v31_v12 = vld [vmem:[#allocation2 + $0x10] sm:$0xff]  ;;  %v29_v13 = vld [vmem:[#allocation2] sm:$0xff] }
   0x9   :  { %v32_v20 = vld [vmem:[#allocation2 + $0x18] sm:$0xff]  ;;  %v30_v21 = vld [vmem:[#allocation2 + $0x8] sm:$0xff] }
   0xa   :  { %v33_v30 = vld [vmem:[#allocation2 + $0x20] sm:$0xff]  ;;  %v34_v39 = vld [vmem:[#allocation2 + $0x28] sm:$0xff] }
   0xb   :  { %355 = vmatpush3.bf16.msra.mxu1 %v365_v3  ;;  %322 = vmatpush3.bf16.msra.mxu0 %v365_v3 }
   0xc   :  { %348 = vmatprep.subr.bf16.mxu1 %v374_v0  ;;  %323 = vmatprep.subr.bf16.mxu0 %v374_v0 }
   0xf   :  { %356 = vmatpush3.bf16.msra.mxu1 %v366_v4  ;;  %324 = vmatpush3.bf16.msra.mxu0 %v366_v4 }
  0x10   :  { %349 = vmatprep.subr.bf16.mxu1 %v374_v0  ;;  %325 = vmatprep.subr.bf16.mxu0 %v374_v0 }
  0x13   :  { %357 = vmatpush3.bf16.msra.mxu1 %v367_v5  ;;  %326 = vmatpush3.bf16.msra.mxu0 %v367_v5 }
  0x14   :  { %350 = vmatprep.subr.bf16.mxu1 %v374_v0  ;;  %327 = vmatprep.subr.bf16.mxu0 %v374_v0 }
  0x17   :  { %358 = vmatpush3.bf16.msra.mxu1 %v368_v6  ;;  %328 = vmatpush3.bf16.msra.mxu0 %v368_v6 }
  0x18   :  { %351 = vmatprep.subr.bf16.mxu1 %v374_v0  ;;  %329 = vmatprep.subr.bf16.mxu0 %v374_v0 }
  0x1b   :  { %359 = vmatpush3.bf16.msra.mxu1 %v369_v7  ;;  %330 = vmatpush3.bf16.msra.mxu0 %v369_v7 }
  0x1c   :  { %352 = vmatprep.subr.bf16.mxu1 %v374_v0  ;;  %331 = vmatprep.subr.bf16.mxu0 %v374_v0 }
  0x1f   :  { %360 = vmatpush3.bf16.msra.mxu1 %v370_v8  ;;  %332 = vmatpush3.bf16.msra.mxu0 %v370_v8 }
  0x22   :  { %338 = vmatmul.mubr.bf16.vlgmr.msra.gmra.mxu1 %v371_v9  ;;  %334 = vmatmul.mubr.bf16.vlgmr.msra.gmra.mxu0 %v372_v10 }
  0x23   :  { %341 = vmatprep.mubr.msk.bf16.mxu1 %vm375_vm1, %v374_v0  ;;  %v303_v0 = vunpack.c.h.bf16 %v305_v50 }
  0x2a   :  { %342 = vmatmul.mubr.bf16.gmra.mxu1 %v373_v11 }
  0xe2   :  { %v165_v14 = vpop.f32.mrf.mxu1  ;;  %v157_v15 = vpop.f32.mrf.mxu0 }
  0xe3   :  { %v182_v16 = vadd.f32 %v165_v14, %v31_v12  ;;  %v180_v17 = vadd.f32 %v157_v15, %v29_v13 }
  0xe4   :  { %v339_v18 = vpop.f32.mrf.mxu1  ;;  %v335_v19 = vpop.f32.mrf.mxu0 }
  0xe5   :  { %189 = vst.msk [vmem:[#allocation2 + $0x10] sm:$0xff] %vm22_vm0, %v182_v16  ;;  %187 = vst.msk [vmem:[#allocation2] sm:$0xff] %vm22_vm0, %v180_v17 }
  0xe6   :  { %v168_v22 = vpop.f32.mrf.mxu1  ;;  %v160_v23 = vpop.f32.mrf.mxu0 }
  0xe7   :  { %v183_v24 = vadd.f32 %v168_v22, %v32_v20  ;;  %v181_v25 = vadd.f32 %v160_v23, %v30_v21 }
  0xe8   :  { %v340_v28 = vpop.f32.mrf.mxu1  ;;  %v336_v29 = vpop.f32.mrf.mxu0 }
  0xe9   :  { %190 = vst.msk [vmem:[#allocation2 + $0x18] sm:$0xff] %vm22_vm0, %v183_v24  ;;  %188 = vst.msk [vmem:[#allocation2 + $0x8] sm:$0xff] %vm22_vm0, %v181_v25 }
  0xea   :  { %v173_v32 = vpop.f32.mrf.mxu1 }
  0xeb   :  { %v184_v35 = vadd.f32 %v173_v32, %v33_v30 }
  0xec   :  { %v198_v36 = vld [vmem:[#allocation2 + $0x10] sm:$0xff]  ;;  %v196_v37 = vld [vmem:[#allocation2] sm:$0xff]  ;;  %v343_v38 = vpop.f32.mrf.mxu1 }
  0xed   :  { %v211_v40 = vadd.f32 %v279_v31, %v198_v36  ;;  %v209_v41 = vadd.f32 %v279_v31, %v196_v37  ;;  %191 = vst.msk [vmem:[#allocation2 + $0x20] sm:$0xff] %vm22_vm0, %v184_v35 }
  0xee   :  { %v176_v43 = vpop.f32.mrf.mxu1 }
  0xef   :  { %v229_v44 = vadd.f32 %v298_v33, %v211_v40  ;;  %v227_v45 = vadd.f32 %v294_v34, %v209_v41  ;;  %v185_v47 = vadd.f32 %v176_v43, %v34_v39 }
  0xf0   :  { %v199_v48 = vld [vmem:[#allocation2 + $0x18] sm:$0xff]  ;;  %v197_v49 = vld [vmem:[#allocation2 + $0x8] sm:$0xff]  ;;  %v344_v51 = vpop.f32.mrf.mxu1 }
  0xf1   :  { %v288_v52 = vpack.c.bf16 %v229_v44, %v229_v44  ;;  %v286_v53 = vpack.c.bf16 %v227_v45, %v227_v45  ;;  %v212_v54 = vadd.f32 %v279_v31, %v199_v48  ;;  %v210_v55 = vadd.f32 %v279_v31, %v197_v49  ;;  %192 = vst.msk [vmem:[#allocation2 + $0x28] sm:$0xff] %vm22_vm0, %v185_v47 }
  0xf3   :  { %260 = vst.msk [vmem:[%s489_s4 + $0x8] sm:$0xf] %vm257_vm2, %v288_v52  ;;  %258 = vst.msk [vmem:[%s489_s4] sm:$0xf] %vm257_vm2, %v286_v53  ;;  %v230_v56 = vadd.f32 %v299_v42, %v212_v54  ;;  %v228_v57 = vadd.f32 %v295_v46, %v210_v55 }
  0xf4   :  { %v200_v59 = vld [vmem:[#allocation2 + $0x20] sm:$0xff] }
  0xf5   :  { %v289_v60 = vpack.c.bf16 %v230_v56, %v230_v56  ;;  %v287_v61 = vpack.c.bf16 %v228_v57, %v228_v57  ;;  %v213_v62 = vadd.f32 %v279_v31, %v200_v59 }
  0xf7   :  { %261 = vst.msk [vmem:[%s489_s4 + $0xc] sm:$0xf] %vm257_vm2, %v289_v60  ;;  %259 = vst.msk [vmem:[%s489_s4 + $0x4] sm:$0xf] %vm257_vm2, %v287_v61  ;;  %v231_v63 = vadd.f32 %v302_v58, %v213_v62 }
  0xf8   :  { %v201_v1 = vld [vmem:[#allocation2 + $0x28] sm:$0xff] }
  0xf9   :  { %v290_v2 = vpack.c.bf16 %v231_v63, %v231_v63  ;;  %v214_v3 = vadd.f32 %v279_v31, %v201_v1 }
  0xfb   :  { %262 = vst.msk [vmem:[%s489_s4 + $0x10] sm:$0xf] %vm257_vm2, %v290_v2  ;;  %v232_v4 = vadd.f32 %v303_v0, %v214_v3 }
  0xfd   :  { %v291_v5 = vpack.c.bf16 %v232_v4, %v232_v4 }
  0xff   :  { %263 = vst.msk [vmem:[%s489_s4 + $0x14] sm:$0xf] %vm257_vm2, %v291_v5 }

</bundles_post_ra>
